<compile_context>
chip_gen: v5e
topology: v5e:2x2
jax: 0.10.0
libtpu: 0.0.40
codegen_flags: <defaults>
</compile_context>

<pallas_src>
import functools

import jax
import jax.numpy as jnp
from jax.experimental import pallas as pl
from jax.experimental.pallas import tpu as pltpu


def _make_divisible(v, divisor=8, min_value=None):
    if min_value is None:
        min_value = divisor
    new_v = max(min_value, int(v + divisor / 2) // divisor * divisor)
    if new_v < 0.9 * v:
        new_v += divisor
    return new_v


def _relu6(x):
    return jnp.minimum(jnp.maximum(x, 0.0), 6.0)


def inverted_residual_kernel(x_ref, w1_ref, b1_ref, wdp_ref, bd_ref,
                             w2_ref, b2_ref, o_ref, *, H, W, use_res, nb):
    # x_ref block: [nb, Cin, H*W]  (flattened NCHW).
    HW = H * W
    # Static unroll over the batch elements of this block: one grid step / one
    # DMA for the whole block, every op stays 2-D [C, HW] and lane-dense.
    for n in range(nb):
        x = x_ref[n]                                          # [Cin, HW]

        # --- 1x1 expand conv (+ folded BN) + ReLU6  (MXU) ---
        h = jnp.dot(w1_ref[...], x, preferred_element_type=jnp.float32)
        h = _relu6(h + b1_ref[...])                           # [hidden, HW]

        # --- 3x3 depthwise conv, stride 1, pad 1 (+ folded BN) + ReLU6 ---
        # 8 static lane rolls (XLU slot); per-tap weight*edge-mask planes were
        # pre-baked in the wrapper, so each tap is a single multiply-add.
        acc = h * wdp_ref[4]                                  # center tap
        for dh in (-1, 0, 1):
            for dw in (-1, 0, 1):
                if dh == 0 and dw == 0:
                    continue
                s = dh * W + dw                               # flattened offset
                k = (dh + 1) * 3 + (dw + 1)
                shifted = pltpu.roll(h, shift=(-s) % HW, axis=1)
                acc = acc + shifted * wdp_ref[k]
        acc = _relu6(acc + bd_ref[...])

        # --- 1x1 project conv (+ folded BN), linear  (MXU) ---
        y = jnp.dot(w2_ref[...], acc, preferred_element_type=jnp.float32)
        y = y + b2_ref[...]                                   # [Cout, HW]
        if use_res:
            y = y + x
        o_ref[n] = y.astype(o_ref.dtype)


def _bake_depthwise_planes(wd, H, W):
    """wd: [hidden, 9] BN-folded depthwise weights -> [9, hidden, H*W] planes
    with the zero-padding edge masks pre-multiplied in (plain JAX glue)."""
    HW = H * W
    lane = jnp.arange(HW, dtype=jnp.int32)
    row, col = lane // W, lane % W
    planes = []
    for dh in (-1, 0, 1):
        for dw in (-1, 0, 1):
            k = (dh + 1) * 3 + (dw + 1)
            rv = jnp.ones((HW,), jnp.bool_) if dh == 0 else \
                (row > 0 if dh < 0 else row < H - 1)
            cv = jnp.ones((HW,), jnp.bool_) if dw == 0 else \
                (col > 0 if dw < 0 else col < W - 1)
            mask = (rv & cv).astype(wd.dtype)                 # [HW]
            planes.append(wd[:, k][:, None] * mask[None, :])  # [hidden, HW]
    return jnp.stack(planes, axis=0)                          # [9, hidden, HW]


def inverted_residual(x_nchw, params, *, stride, use_res,
                      batch_block=None, core_split=False):
    # TODO(synk): stride=2 depthwise subsampling and the expand_ratio==1
    # (no-expand) variant are not implemented in this Pallas kernel.
    assert stride == 1, "only stride=1 supported in this Pallas implementation"
    N, Cin, H, W = x_nchw.shape
    HW = H * W
    x = x_nchw.reshape(N, Cin, HW)                            # pure view
    w1, b1, wd, bd, w2, b2 = params
    hidden = w1.shape[0]
    Cout = w2.shape[0]

    # Pre-bake (tiny, plain JAX): masked per-tap weight planes and
    # lane-broadcast biases, so the kernel does no mask / broadcast work.
    wdp = _bake_depthwise_planes(wd, H, W)                    # [9, hidden, HW]
    b1b = jnp.broadcast_to(b1, (hidden, HW))
    bdb = jnp.broadcast_to(bd, (hidden, HW))
    b2b = jnp.broadcast_to(b2, (Cout, HW))

    # Default: whole batch in a single grid step (best on 1-TC v5e/v6e).
    # On v7x use batch_block=N//2, core_split=True so each TensorCore gets one
    # block (pltpu.CORE_PARALLEL actually shards the grid across cores).
    nb = N if batch_block is None else batch_block
    assert N % nb == 0, "batch_block must divide N"
    grid = (N // nb,)
    sem = (pltpu.CORE_PARALLEL,) if core_split else ("arbitrary",)

    kern = functools.partial(inverted_residual_kernel, H=H, W=W,
                             use_res=use_res, nb=nb)
    out = pl.pallas_call(
        kern,
        out_shape=jax.ShapeDtypeStruct((N, Cout, HW), x.dtype),
        grid=grid,
        in_specs=[
            pl.BlockSpec((nb, Cin, HW), lambda i: (i, 0, 0)),      # x
            pl.BlockSpec(w1.shape, lambda i: (0, 0)),              # [hidden, Cin]
            pl.BlockSpec((hidden, HW), lambda i: (0, 0)),          # b1 (broadcast)
            pl.BlockSpec((9, hidden, HW), lambda i: (0, 0, 0)),    # masked taps
            pl.BlockSpec((hidden, HW), lambda i: (0, 0)),          # bd (broadcast)
            pl.BlockSpec(w2.shape, lambda i: (0, 0)),              # [Cout, hidden]
            pl.BlockSpec((Cout, HW), lambda i: (0, 0)),            # b2 (broadcast)
        ],
        out_specs=pl.BlockSpec((nb, Cout, HW), lambda i: (i, 0, 0)),
        compiler_params=pltpu.CompilerParams(dimension_semantics=sem),
    )(x, w1, b1b, wdp, bdb, w2, b2b)
    return out.reshape(N, Cout, H, W)                         # pure view


def init_params(key, inp, oup, hidden, ksize=3, eps=1e-5):
    """Deterministic synthetic params; eval-mode BatchNorm folded into convs."""
    ks = jax.random.split(key, 6)
    w1 = 0.1 * jax.random.normal(ks[0], (hidden, inp, 1, 1), jnp.float32)        # expand
    wd = 0.1 * jax.random.normal(ks[1], (hidden, 1, ksize, ksize), jnp.float32)  # depthwise
    w2 = 0.1 * jax.random.normal(ks[2], (oup, hidden, 1, 1), jnp.float32)        # project

    def bn_params(k, c):
        k1, k2, k3, k4 = jax.random.split(k, 4)
        gamma = 1.0 + 0.1 * jax.random.normal(k1, (c,), jnp.float32)
        beta = 0.1 * jax.random.normal(k2, (c,), jnp.float32)
        mean = 0.1 * jax.random.normal(k3, (c,), jnp.float32)
        var = jnp.abs(jax.random.normal(k4, (c,), jnp.float32)) + 0.5
        return gamma, beta, mean, var

    g1, be1, m1, v1 = bn_params(ks[3], hidden)
    gd, bed, md, vd = bn_params(ks[4], hidden)
    g2, be2, m2, v2 = bn_params(ks[5], oup)

    s1 = g1 / jnp.sqrt(v1 + eps)
    sd = gd / jnp.sqrt(vd + eps)
    s2 = g2 / jnp.sqrt(v2 + eps)

    # Fold BN: y = s*(conv(x) - mean) + beta  ==  conv(x; w*s) + (beta - mean*s)
    w1f = w1[:, :, 0, 0] * s1[:, None]                                           # [hidden, inp]
    b1f = (be1 - m1 * s1)[:, None]                                               # [hidden, 1]
    wdf = wd[:, 0, :, :].reshape(hidden, ksize * ksize) * sd[:, None]            # [hidden, 9]
    bdf = (bed - md * sd)[:, None]                                               # [hidden, 1]
    w2f = w2[:, :, 0, 0] * s2[:, None]                                           # [oup, hidden]
    b2f = (be2 - m2 * s2)[:, None]                                               # [oup, 1]
    return (w1f, b1f, wdf, bdf, w2f, b2f)


def reference(x_nchw, params, use_res):
    """Pure-JAX reference of the same folded math (correctness check)."""
    w1, b1, wd, bd, w2, b2 = params
    N, Cin, H, W = x_nchw.shape
    h = jnp.einsum('oc,ncxy->noxy', w1, x_nchw) + b1[None, :, :, None]
    h = _relu6(h)
    hp = jnp.pad(h, ((0, 0), (0, 0), (1, 1), (1, 1)))
    acc = jnp.zeros_like(h)
    for kh in range(3):
        for kw in range(3):
            acc = acc + hp[:, :, kh:kh + H, kw:kw + W] \
                * wd[:, kh * 3 + kw][None, :, None, None]
    acc = _relu6(acc + bd[None, :, :, None])
    y = jnp.einsum('oc,ncxy->noxy', w2, acc) + b2[None, :, :, None]
    if use_res:
        y = y + x_nchw
    return y


if __name__ == "__main__":
    # InvertedResidual(inp=8, oup=8, stride=1, expand_ratio=4) -> residual path.
    inp_raw, oup_raw, stride, expand_ratio = 8, 8, 1, 4
    inp = _make_divisible(inp_raw)
    oup = _make_divisible(oup_raw)
    hidden = _make_divisible(round(inp * expand_ratio))
    use_res = (stride == 1 and inp == oup)

    key = jax.random.PRNGKey(0)
    kx, kp = jax.random.split(key)
    x = jax.random.normal(kx, (2, inp, 16, 16), dtype=jnp.float32)   # NCHW
    params = init_params(kp, inp, oup, hidden)

    y = inverted_residual(x, params, stride=stride, use_res=use_res)
    y = jax.block_until_ready(y)

    assert y.shape == (2, oup, 16, 16), y.shape
    y_ref = reference(x, params, use_res)
    assert jnp.allclose(y, y_ref, atol=1e-4, rtol=1e-4), "mismatch vs JAX reference"
    print("KERNEL_OK")
</pallas_src>

<mosaic_0001>
module attributes {stable_mosaic.version = 11 : i64} {
  func.func @inverted_residual_kernel(%arg0: i32, %arg1: memref<2x8x256xf32, #tpu.memory_space<vmem>>, %arg2: memref<32x8xf32, #tpu.memory_space<vmem>>, %arg3: memref<32x256xf32, #tpu.memory_space<vmem>>, %arg4: memref<9x32x256xf32, #tpu.memory_space<vmem>>, %arg5: memref<32x256xf32, #tpu.memory_space<vmem>>, %arg6: memref<8x32xf32, #tpu.memory_space<vmem>>, %arg7: memref<8x256xf32, #tpu.memory_space<vmem>>, %arg8: memref<2x8x256xf32, #tpu.memory_space<vmem>>) attributes {dimension_semantics = [#tpu.dimension_semantics<arbitrary>], iteration_bounds = array<i64: 1>, scalar_prefetch = 0 : i64, scratch_operands = 0 : i64, tpu.core_type = #tpu.core_type<tc>, window_params = [{transform_indices = @transform_0, window_bounds = array<i64: 2, 8, 256>}, {pipeline_mode = #tpu.pipeline_mode<synchronous>, transform_indices = @transform_1, window_bounds = array<i64: 32, 8>}, {pipeline_mode = #tpu.pipeline_mode<synchronous>, transform_indices = @transform_2, window_bounds = array<i64: 32, 256>}, {pipeline_mode = #tpu.pipeline_mode<synchronous>, transform_indices = @transform_3, window_bounds = array<i64: 9, 32, 256>}, {pipeline_mode = #tpu.pipeline_mode<synchronous>, transform_indices = @transform_4, window_bounds = array<i64: 32, 256>}, {pipeline_mode = #tpu.pipeline_mode<synchronous>, transform_indices = @transform_5, window_bounds = array<i64: 8, 32>}, {pipeline_mode = #tpu.pipeline_mode<synchronous>, transform_indices = @transform_6, window_bounds = array<i64: 8, 256>}, {transform_indices = @transform_7, window_bounds = array<i64: 2, 8, 256>}]} {
    %c0 = arith.constant 0 : index
    %c0_0 = arith.constant 0 : index
    %c0_1 = arith.constant 0 : index
    %0 = vector.load %arg1[%c0, %c0_0, %c0_1] : memref<2x8x256xf32, #tpu.memory_space<vmem>>, vector<1x8x256xf32>
    %1 = vector.shape_cast %0 : vector<1x8x256xf32> to vector<8x256xf32>
    %c0_2 = arith.constant 0 : index
    %c0_3 = arith.constant 0 : index
    %2 = vector.load %arg2[%c0_2, %c0_3] : memref<32x8xf32, #tpu.memory_space<vmem>>, vector<32x8xf32>
    %cst = arith.constant dense<0.000000e+00> : vector<32x256xf32>
    %3 = tpu.matmul %2, %1, %cst {dimension_numbers = #tpu.dot_dimension_numbers<[1], [0], [0], [1], [0, 0, 1, 1], [], []>} : vector<32x8xf32>, vector<8x256xf32>, vector<32x256xf32> -> vector<32x256xf32>
    %c0_4 = arith.constant 0 : index
    %c0_5 = arith.constant 0 : index
    %4 = vector.load %arg3[%c0_4, %c0_5] : memref<32x256xf32, #tpu.memory_space<vmem>>, vector<32x256xf32>
    %5 = arith.addf %3, %4 : vector<32x256xf32>
    %cst_6 = arith.constant 0.000000e+00 : f32
    %6 = vector.broadcast %cst_6 : f32 to vector<32x256xf32>
    %7 = arith.maximumf %5, %6 : vector<32x256xf32>
    %cst_7 = arith.constant 6.000000e+00 : f32
    %8 = vector.broadcast %cst_7 : f32 to vector<32x256xf32>
    %9 = arith.minimumf %7, %8 : vector<32x256xf32>
    %c4 = arith.constant 4 : index
    %c0_8 = arith.constant 0 : index
    %c0_9 = arith.constant 0 : index
    %10 = vector.load %arg4[%c4, %c0_8, %c0_9] : memref<9x32x256xf32, #tpu.memory_space<vmem>>, vector<1x32x256xf32>
    %11 = vector.shape_cast %10 : vector<1x32x256xf32> to vector<32x256xf32>
    %12 = arith.mulf %9, %11 : vector<32x256xf32>
    %c17_i32 = arith.constant 17 : i32
    %13 = tpu.dynamic_rotate %9 by %c17_i32 dim 1 : vector<32x256xf32>, i32 -> vector<32x256xf32>
    %c0_10 = arith.constant 0 : index
    %c0_11 = arith.constant 0 : index
    %c0_12 = arith.constant 0 : index
    %14 = vector.load %arg4[%c0_10, %c0_11, %c0_12] : memref<9x32x256xf32, #tpu.memory_space<vmem>>, vector<1x32x256xf32>
    %15 = vector.shape_cast %14 : vector<1x32x256xf32> to vector<32x256xf32>
    %16 = arith.mulf %13, %15 : vector<32x256xf32>
    %17 = arith.addf %12, %16 : vector<32x256xf32>
    %c16_i32 = arith.constant 16 : i32
    %18 = tpu.dynamic_rotate %9 by %c16_i32 dim 1 : vector<32x256xf32>, i32 -> vector<32x256xf32>
    %c1 = arith.constant 1 : index
    %c0_13 = arith.constant 0 : index
    %c0_14 = arith.constant 0 : index
    %19 = vector.load %arg4[%c1, %c0_13, %c0_14] : memref<9x32x256xf32, #tpu.memory_space<vmem>>, vector<1x32x256xf32>
    %20 = vector.shape_cast %19 : vector<1x32x256xf32> to vector<32x256xf32>
    %21 = arith.mulf %18, %20 : vector<32x256xf32>
    %22 = arith.addf %17, %21 : vector<32x256xf32>
    %c15_i32 = arith.constant 15 : i32
    %23 = tpu.dynamic_rotate %9 by %c15_i32 dim 1 : vector<32x256xf32>, i32 -> vector<32x256xf32>
    %c2 = arith.constant 2 : index
    %c0_15 = arith.constant 0 : index
    %c0_16 = arith.constant 0 : index
    %24 = vector.load %arg4[%c2, %c0_15, %c0_16] : memref<9x32x256xf32, #tpu.memory_space<vmem>>, vector<1x32x256xf32>
    %25 = vector.shape_cast %24 : vector<1x32x256xf32> to vector<32x256xf32>
    %26 = arith.mulf %23, %25 : vector<32x256xf32>
    %27 = arith.addf %22, %26 : vector<32x256xf32>
    %c1_i32 = arith.constant 1 : i32
    %28 = tpu.dynamic_rotate %9 by %c1_i32 dim 1 : vector<32x256xf32>, i32 -> vector<32x256xf32>
    %c3 = arith.constant 3 : index
    %c0_17 = arith.constant 0 : index
    %c0_18 = arith.constant 0 : index
    %29 = vector.load %arg4[%c3, %c0_17, %c0_18] : memref<9x32x256xf32, #tpu.memory_space<vmem>>, vector<1x32x256xf32>
    %30 = vector.shape_cast %29 : vector<1x32x256xf32> to vector<32x256xf32>
    %31 = arith.mulf %28, %30 : vector<32x256xf32>
    %32 = arith.addf %27, %31 : vector<32x256xf32>
    %c255_i32 = arith.constant 255 : i32
    %33 = tpu.dynamic_rotate %9 by %c255_i32 dim 1 : vector<32x256xf32>, i32 -> vector<32x256xf32>
    %c5 = arith.constant 5 : index
    %c0_19 = arith.constant 0 : index
    %c0_20 = arith.constant 0 : index
    %34 = vector.load %arg4[%c5, %c0_19, %c0_20] : memref<9x32x256xf32, #tpu.memory_space<vmem>>, vector<1x32x256xf32>
    %35 = vector.shape_cast %34 : vector<1x32x256xf32> to vector<32x256xf32>
    %36 = arith.mulf %33, %35 : vector<32x256xf32>
    %37 = arith.addf %32, %36 : vector<32x256xf32>
    %c241_i32 = arith.constant 241 : i32
    %38 = tpu.dynamic_rotate %9 by %c241_i32 dim 1 : vector<32x256xf32>, i32 -> vector<32x256xf32>
    %c6 = arith.constant 6 : index
    %c0_21 = arith.constant 0 : index
    %c0_22 = arith.constant 0 : index
    %39 = vector.load %arg4[%c6, %c0_21, %c0_22] : memref<9x32x256xf32, #tpu.memory_space<vmem>>, vector<1x32x256xf32>
    %40 = vector.shape_cast %39 : vector<1x32x256xf32> to vector<32x256xf32>
    %41 = arith.mulf %38, %40 : vector<32x256xf32>
    %42 = arith.addf %37, %41 : vector<32x256xf32>
    %c240_i32 = arith.constant 240 : i32
    %43 = tpu.dynamic_rotate %9 by %c240_i32 dim 1 : vector<32x256xf32>, i32 -> vector<32x256xf32>
    %c7 = arith.constant 7 : index
    %c0_23 = arith.constant 0 : index
    %c0_24 = arith.constant 0 : index
    %44 = vector.load %arg4[%c7, %c0_23, %c0_24] : memref<9x32x256xf32, #tpu.memory_space<vmem>>, vector<1x32x256xf32>
    %45 = vector.shape_cast %44 : vector<1x32x256xf32> to vector<32x256xf32>
    %46 = arith.mulf %43, %45 : vector<32x256xf32>
    %47 = arith.addf %42, %46 : vector<32x256xf32>
    %c239_i32 = arith.constant 239 : i32
    %48 = tpu.dynamic_rotate %9 by %c239_i32 dim 1 : vector<32x256xf32>, i32 -> vector<32x256xf32>
    %c8 = arith.constant 8 : index
    %c0_25 = arith.constant 0 : index
    %c0_26 = arith.constant 0 : index
    %49 = vector.load %arg4[%c8, %c0_25, %c0_26] : memref<9x32x256xf32, #tpu.memory_space<vmem>>, vector<1x32x256xf32>
    %50 = vector.shape_cast %49 : vector<1x32x256xf32> to vector<32x256xf32>
    %51 = arith.mulf %48, %50 : vector<32x256xf32>
    %52 = arith.addf %47, %51 : vector<32x256xf32>
    %c0_27 = arith.constant 0 : index
    %c0_28 = arith.constant 0 : index
    %53 = vector.load %arg5[%c0_27, %c0_28] : memref<32x256xf32, #tpu.memory_space<vmem>>, vector<32x256xf32>
    %54 = arith.addf %52, %53 : vector<32x256xf32>
    %cst_29 = arith.constant 0.000000e+00 : f32
    %55 = vector.broadcast %cst_29 : f32 to vector<32x256xf32>
    %56 = arith.maximumf %54, %55 : vector<32x256xf32>
    %cst_30 = arith.constant 6.000000e+00 : f32
    %57 = vector.broadcast %cst_30 : f32 to vector<32x256xf32>
    %58 = arith.minimumf %56, %57 : vector<32x256xf32>
    %c0_31 = arith.constant 0 : index
    %c0_32 = arith.constant 0 : index
    %59 = vector.load %arg6[%c0_31, %c0_32] : memref<8x32xf32, #tpu.memory_space<vmem>>, vector<8x32xf32>
    %cst_33 = arith.constant dense<0.000000e+00> : vector<8x256xf32>
    %60 = tpu.matmul %59, %58, %cst_33 {dimension_numbers = #tpu.dot_dimension_numbers<[1], [0], [0], [1], [0, 0, 1, 1], [], []>} : vector<8x32xf32>, vector<32x256xf32>, vector<8x256xf32> -> vector<8x256xf32>
    %c0_34 = arith.constant 0 : index
    %c0_35 = arith.constant 0 : index
    %61 = vector.load %arg7[%c0_34, %c0_35] : memref<8x256xf32, #tpu.memory_space<vmem>>, vector<8x256xf32>
    %62 = arith.addf %60, %61 : vector<8x256xf32>
    %63 = arith.addf %62, %1 : vector<8x256xf32>
    %c0_36 = arith.constant 0 : index
    %c0_37 = arith.constant 0 : index
    %c0_38 = arith.constant 0 : index
    %64 = vector.load %arg8[%c0_36, %c0_37, %c0_38] : memref<2x8x256xf32, #tpu.memory_space<vmem>>, vector<1x8x256xf32>
    %65 = vector.shape_cast %64 : vector<1x8x256xf32> to vector<8x256xf32>
    %66 = vector.shape_cast %63 : vector<8x256xf32> to vector<1x8x256xf32>
    tpu.vector_store %arg8[%c0_36, %c0_37, %c0_38], %66 {strides = array<i32>} : memref<2x8x256xf32, #tpu.memory_space<vmem>>, vector<1x8x256xf32>,
    %c1_39 = arith.constant 1 : index
    %c0_40 = arith.constant 0 : index
    %c0_41 = arith.constant 0 : index
    %67 = vector.load %arg1[%c1_39, %c0_40, %c0_41] : memref<2x8x256xf32, #tpu.memory_space<vmem>>, vector<1x8x256xf32>
    %68 = vector.shape_cast %67 : vector<1x8x256xf32> to vector<8x256xf32>
    %c0_42 = arith.constant 0 : index
    %c0_43 = arith.constant 0 : index
    %69 = vector.load %arg2[%c0_42, %c0_43] : memref<32x8xf32, #tpu.memory_space<vmem>>, vector<32x8xf32>
    %cst_44 = arith.constant dense<0.000000e+00> : vector<32x256xf32>
    %70 = tpu.matmul %69, %68, %cst_44 {dimension_numbers = #tpu.dot_dimension_numbers<[1], [0], [0], [1], [0, 0, 1, 1], [], []>} : vector<32x8xf32>, vector<8x256xf32>, vector<32x256xf32> -> vector<32x256xf32>
    %c0_45 = arith.constant 0 : index
    %c0_46 = arith.constant 0 : index
    %71 = vector.load %arg3[%c0_45, %c0_46] : memref<32x256xf32, #tpu.memory_space<vmem>>, vector<32x256xf32>
    %72 = arith.addf %70, %71 : vector<32x256xf32>
    %cst_47 = arith.constant 0.000000e+00 : f32
    %73 = vector.broadcast %cst_47 : f32 to vector<32x256xf32>
    %74 = arith.maximumf %72, %73 : vector<32x256xf32>
    %cst_48 = arith.constant 6.000000e+00 : f32
    %75 = vector.broadcast %cst_48 : f32 to vector<32x256xf32>
    %76 = arith.minimumf %74, %75 : vector<32x256xf32>
    %c4_49 = arith.constant 4 : index
    %c0_50 = arith.constant 0 : index
    %c0_51 = arith.constant 0 : index
    %77 = vector.load %arg4[%c4_49, %c0_50, %c0_51] : memref<9x32x256xf32, #tpu.memory_space<vmem>>, vector<1x32x256xf32>
    %78 = vector.shape_cast %77 : vector<1x32x256xf32> to vector<32x256xf32>
    %79 = arith.mulf %76, %78 : vector<32x256xf32>
    %c17_i32_52 = arith.constant 17 : i32
    %80 = tpu.dynamic_rotate %76 by %c17_i32_52 dim 1 : vector<32x256xf32>, i32 -> vector<32x256xf32>
    %c0_53 = arith.constant 0 : index
    %c0_54 = arith.constant 0 : index
    %c0_55 = arith.constant 0 : index
    %81 = vector.load %arg4[%c0_53, %c0_54, %c0_55] : memref<9x32x256xf32, #tpu.memory_space<vmem>>, vector<1x32x256xf32>
    %82 = vector.shape_cast %81 : vector<1x32x256xf32> to vector<32x256xf32>
    %83 = arith.mulf %80, %82 : vector<32x256xf32>
    %84 = arith.addf %79, %83 : vector<32x256xf32>
    %c16_i32_56 = arith.constant 16 : i32
    %85 = tpu.dynamic_rotate %76 by %c16_i32_56 dim 1 : vector<32x256xf32>, i32 -> vector<32x256xf32>
    %c1_57 = arith.constant 1 : index
    %c0_58 = arith.constant 0 : index
    %c0_59 = arith.constant 0 : index
    %86 = vector.load %arg4[%c1_57, %c0_58, %c0_59] : memref<9x32x256xf32, #tpu.memory_space<vmem>>, vector<1x32x256xf32>
    %87 = vector.shape_cast %86 : vector<1x32x256xf32> to vector<32x256xf32>
    %88 = arith.mulf %85, %87 : vector<32x256xf32>
    %89 = arith.addf %84, %88 : vector<32x256xf32>
    %c15_i32_60 = arith.constant 15 : i32
    %90 = tpu.dynamic_rotate %76 by %c15_i32_60 dim 1 : vector<32x256xf32>, i32 -> vector<32x256xf32>
    %c2_61 = arith.constant 2 : index
    %c0_62 = arith.constant 0 : index
    %c0_63 = arith.constant 0 : index
    %91 = vector.load %arg4[%c2_61, %c0_62, %c0_63] : memref<9x32x256xf32, #tpu.memory_space<vmem>>, vector<1x32x256xf32>
    %92 = vector.shape_cast %91 : vector<1x32x256xf32> to vector<32x256xf32>
    %93 = arith.mulf %90, %92 : vector<32x256xf32>
    %94 = arith.addf %89, %93 : vector<32x256xf32>
    %c1_i32_64 = arith.constant 1 : i32
    %95 = tpu.dynamic_rotate %76 by %c1_i32_64 dim 1 : vector<32x256xf32>, i32 -> vector<32x256xf32>
    %c3_65 = arith.constant 3 : index
    %c0_66 = arith.constant 0 : index
    %c0_67 = arith.constant 0 : index
    %96 = vector.load %arg4[%c3_65, %c0_66, %c0_67] : memref<9x32x256xf32, #tpu.memory_space<vmem>>, vector<1x32x256xf32>
    %97 = vector.shape_cast %96 : vector<1x32x256xf32> to vector<32x256xf32>
    %98 = arith.mulf %95, %97 : vector<32x256xf32>
    %99 = arith.addf %94, %98 : vector<32x256xf32>
    %c255_i32_68 = arith.constant 255 : i32
    %100 = tpu.dynamic_rotate %76 by %c255_i32_68 dim 1 : vector<32x256xf32>, i32 -> vector<32x256xf32>
    %c5_69 = arith.constant 5 : index
    %c0_70 = arith.constant 0 : index
    %c0_71 = arith.constant 0 : index
    %101 = vector.load %arg4[%c5_69, %c0_70, %c0_71] : memref<9x32x256xf32, #tpu.memory_space<vmem>>, vector<1x32x256xf32>
    %102 = vector.shape_cast %101 : vector<1x32x256xf32> to vector<32x256xf32>
    %103 = arith.mulf %100, %102 : vector<32x256xf32>
    %104 = arith.addf %99, %103 : vector<32x256xf32>
    %c241_i32_72 = arith.constant 241 : i32
    %105 = tpu.dynamic_rotate %76 by %c241_i32_72 dim 1 : vector<32x256xf32>, i32 -> vector<32x256xf32>
    %c6_73 = arith.constant 6 : index
    %c0_74 = arith.constant 0 : index
    %c0_75 = arith.constant 0 : index
    %106 = vector.load %arg4[%c6_73, %c0_74, %c0_75] : memref<9x32x256xf32, #tpu.memory_space<vmem>>, vector<1x32x256xf32>
    %107 = vector.shape_cast %106 : vector<1x32x256xf32> to vector<32x256xf32>
    %108 = arith.mulf %105, %107 : vector<32x256xf32>
    %109 = arith.addf %104, %108 : vector<32x256xf32>
    %c240_i32_76 = arith.constant 240 : i32
    %110 = tpu.dynamic_rotate %76 by %c240_i32_76 dim 1 : vector<32x256xf32>, i32 -> vector<32x256xf32>
    %c7_77 = arith.constant 7 : index
    %c0_78 = arith.constant 0 : index
    %c0_79 = arith.constant 0 : index
    %111 = vector.load %arg4[%c7_77, %c0_78, %c0_79] : memref<9x32x256xf32, #tpu.memory_space<vmem>>, vector<1x32x256xf32>
    %112 = vector.shape_cast %111 : vector<1x32x256xf32> to vector<32x256xf32>
    %113 = arith.mulf %110, %112 : vector<32x256xf32>
    %114 = arith.addf %109, %113 : vector<32x256xf32>
    %c239_i32_80 = arith.constant 239 : i32
    %115 = tpu.dynamic_rotate %76 by %c239_i32_80 dim 1 : vector<32x256xf32>, i32 -> vector<32x256xf32>
    %c8_81 = arith.constant 8 : index
    %c0_82 = arith.constant 0 : index
    %c0_83 = arith.constant 0 : index
    %116 = vector.load %arg4[%c8_81, %c0_82, %c0_83] : memref<9x32x256xf32, #tpu.memory_space<vmem>>, vector<1x32x256xf32>
    %117 = vector.shape_cast %116 : vector<1x32x256xf32> to vector<32x256xf32>
    %118 = arith.mulf %115, %117 : vector<32x256xf32>
    %119 = arith.addf %114, %118 : vector<32x256xf32>
    %c0_84 = arith.constant 0 : index
    %c0_85 = arith.constant 0 : index
    %120 = vector.load %arg5[%c0_84, %c0_85] : memref<32x256xf32, #tpu.memory_space<vmem>>, vector<32x256xf32>
    %121 = arith.addf %119, %120 : vector<32x256xf32>
    %cst_86 = arith.constant 0.000000e+00 : f32
    %122 = vector.broadcast %cst_86 : f32 to vector<32x256xf32>
    %123 = arith.maximumf %121, %122 : vector<32x256xf32>
    %cst_87 = arith.constant 6.000000e+00 : f32
    %124 = vector.broadcast %cst_87 : f32 to vector<32x256xf32>
    %125 = arith.minimumf %123, %124 : vector<32x256xf32>
    %c0_88 = arith.constant 0 : index
    %c0_89 = arith.constant 0 : index
    %126 = vector.load %arg6[%c0_88, %c0_89] : memref<8x32xf32, #tpu.memory_space<vmem>>, vector<8x32xf32>
    %cst_90 = arith.constant dense<0.000000e+00> : vector<8x256xf32>
    %127 = tpu.matmul %126, %125, %cst_90 {dimension_numbers = #tpu.dot_dimension_numbers<[1], [0], [0], [1], [0, 0, 1, 1], [], []>} : vector<8x32xf32>, vector<32x256xf32>, vector<8x256xf32> -> vector<8x256xf32>
    %c0_91 = arith.constant 0 : index
    %c0_92 = arith.constant 0 : index
    %128 = vector.load %arg7[%c0_91, %c0_92] : memref<8x256xf32, #tpu.memory_space<vmem>>, vector<8x256xf32>
    %129 = arith.addf %127, %128 : vector<8x256xf32>
    %130 = arith.addf %129, %68 : vector<8x256xf32>
    %c1_93 = arith.constant 1 : index
    %c0_94 = arith.constant 0 : index
    %c0_95 = arith.constant 0 : index
    %131 = vector.load %arg8[%c1_93, %c0_94, %c0_95] : memref<2x8x256xf32, #tpu.memory_space<vmem>>, vector<1x8x256xf32>
    %132 = vector.shape_cast %131 : vector<1x8x256xf32> to vector<8x256xf32>
    %133 = vector.shape_cast %130 : vector<8x256xf32> to vector<1x8x256xf32>
    tpu.vector_store %arg8[%c1_93, %c0_94, %c0_95], %133 {strides = array<i32>} : memref<2x8x256xf32, #tpu.memory_space<vmem>>, vector<1x8x256xf32>,
    return
  }
  func.func @transform_0(%arg0: i32) -> (i32, i32, i32) {
    %c0_i32 = arith.constant 0 : i32
    %c0_i32_0 = arith.constant 0 : i32
    %c0_i32_1 = arith.constant 0 : i32
    return %arg0, %c0_i32, %c0_i32_0 : i32, i32, i32
  }
  func.func @transform_1(%arg0: i32) -> (i32, i32) {
    %c0_i32 = arith.constant 0 : i32
    %c0_i32_0 = arith.constant 0 : i32
    %c0_i32_1 = arith.constant 0 : i32
    return %c0_i32, %c0_i32_0 : i32, i32
  }
  func.func @transform_2(%arg0: i32) -> (i32, i32) {
    %c0_i32 = arith.constant 0 : i32
    %c0_i32_0 = arith.constant 0 : i32
    %c0_i32_1 = arith.constant 0 : i32
    return %c0_i32, %c0_i32_0 : i32, i32
  }
  func.func @transform_3(%arg0: i32) -> (i32, i32, i32) {
    %c0_i32 = arith.constant 0 : i32
    %c0_i32_0 = arith.constant 0 : i32
    %c0_i32_1 = arith.constant 0 : i32
    %c0_i32_2 = arith.constant 0 : i32
    return %c0_i32, %c0_i32_0, %c0_i32_1 : i32, i32, i32
  }
  func.func @transform_4(%arg0: i32) -> (i32, i32) {
    %c0_i32 = arith.constant 0 : i32
    %c0_i32_0 = arith.constant 0 : i32
    %c0_i32_1 = arith.constant 0 : i32
    return %c0_i32, %c0_i32_0 : i32, i32
  }
  func.func @transform_5(%arg0: i32) -> (i32, i32) {
    %c0_i32 = arith.constant 0 : i32
    %c0_i32_0 = arith.constant 0 : i32
    %c0_i32_1 = arith.constant 0 : i32
    return %c0_i32, %c0_i32_0 : i32, i32
  }
  func.func @transform_6(%arg0: i32) -> (i32, i32) {
    %c0_i32 = arith.constant 0 : i32
    %c0_i32_0 = arith.constant 0 : i32
    %c0_i32_1 = arith.constant 0 : i32
    return %c0_i32, %c0_i32_0 : i32, i32
  }
  func.func @transform_7(%arg0: i32) -> (i32, i32, i32) {
    %c0_i32 = arith.constant 0 : i32
    %c0_i32_0 = arith.constant 0 : i32
    %c0_i32_1 = arith.constant 0 : i32
    return %arg0, %c0_i32, %c0_i32_0 : i32, i32, i32
  }
}

</mosaic_0001>

<bundles_post_ra>
// kernel: tpu_custom_call.1
= control target key start
LH: loop header
LB: loop body
LE: loop exit
PB: predicated region body
PF: predicated region fallthrough
CT: control target
= control target key end

     0   :  { %12 = vsyncpa [#allocation3], 0  ;;  %s2470_s0 = inlined_call_operand.vmem [shape: f32[2,8,256], index: 0, kind: input, shape index: {}]   ;;  %s2471_s1 = inlined_call_operand.vmem [shape: f32[32,8], index: 1, kind: input, shape index: {}]   ;;  %s2472_s2 = inlined_call_operand.hbm [shape: f32[32,256], index: 2, kind: input, shape index: {}]   ;;  %s2473_s3 = inlined_call_operand.hbm [shape: f32[9,32,256], index: 3, kind: input, shape index: {}]   ;;  %s2474_s4 = inlined_call_operand.hbm [shape: f32[32,256], index: 4, kind: input, shape index: {}]   ;;  %s2475_s5 = inlined_call_operand.vmem [shape: f32[8,32], index: 5, kind: input, shape index: {}]   ;;  %s2476_s6 = inlined_call_operand.hbm [shape: f32[8,256], index: 6, kind: input, shape index: {}]   ;;  %s2477_s7 = inlined_call_operand.hbm [shape: f32[2,8,256], index: 7, kind: output, shape index: {}]  }
   0x1   :  { %13 = vsyncpa [#allocation6], 0 }
   0x2   :  { %14 = vsyncpa [#allocation9], 0 }
   0x3   :  { %15 = vsyncpa [#allocation4], 0  ;;  %s37_s26 = sshll.u32 %s2473_s3, 4  ;;  %s1472_s27 = smov [#allocation5]   ;;  %s38_s26 = int_to_ptr.hbm [resolvable:$true] %s37_s26 }
   0x4   :  { %s39_s28 = sshll.u32 %s1472_s27, 4  ;;  %s24_s8 = sshll.u32 %s2472_s2, 4  ;;  %s40_s28 = int_to_ptr.vmem [resolvable:$true] %s39_s28  ;;  %s25_s8 = int_to_ptr.hbm [resolvable:$true] %s24_s8 }
   0x5   :  { %s1473_s9 = smov 256   ;;  %s1474_s10 = smov 16  }
   0x6   :  { %45 = dma.hbm_to_vmem [thread:$0]  %s38_s26, 9216, %s40_s28, [#allocation6], %s1473_s9, %s1473_s9, %s1474_s10  }
   0x7   :  { %s1475_s11 = smov [#allocation2]   ;;  %s50_s3 = sshll.u32 %s2474_s4, 4  ;;  %s51_s3 = int_to_ptr.hbm [resolvable:$true] %s50_s3 }
   0x8   :  { %s26_s12 = sshll.u32 %s1475_s11, 4  ;;  %s66_s16 = sshll.u32 %s2476_s6, 4  ;;  %s27_s12 = int_to_ptr.vmem [resolvable:$true] %s26_s12  ;;  %s67_s16 = int_to_ptr.hbm [resolvable:$true] %s66_s16 }
   0x9   :  { %32 = dma.hbm_to_vmem [thread:$0]  %s25_s8, 1024, %s27_s12, [#allocation3], %s1473_s9, %s1473_s9, %s1474_s10  }
   0xa   :  { %s1476_s17 = smov [#allocation7]   ;;  %s1477_s19 = smov [#allocation8]  }
   0xb   :  { %s52_s18 = sshll.u32 %s1476_s17, 4  ;;  %s68_s4 = sshll.u32 %s1477_s19, 4  ;;  %s53_s18 = int_to_ptr.vmem [resolvable:$true] %s52_s18  ;;  %s69_s4 = int_to_ptr.vmem [resolvable:$true] %s68_s4 }
   0xc   :  { %58 = dma.hbm_to_vmem [thread:$0]  %s51_s3, 1024, %s53_s18, [#allocation6], %s1473_s9, %s1473_s9, %s1474_s10  }
   0xd   :  { %71 = dma.hbm_to_vmem [thread:$0]  %s67_s16, 256, %s69_s4, [#allocation9]  }
   0xe   :  { %1464 = dma.done.wait [#allocation3], 1024  }
   0xf   :  { %1465 = vsyncadd [#allocation3], 4294966272 }
  0x10   :  { %1466 = dma.done.wait [#allocation6], 10240  }
  0x11   :  { %1467 = vsyncadd [#allocation6], 4294957056 }
  0x12   :  { %1468 = dma.done.wait [#allocation9], 256  }
  0x13   :  { %1469 = vsyncadd [#allocation9], 4294967040  ;;  %vm102_vm0 = vcmask 64512   ;;  %v88_v0 = vld [vmem:[%s2470_s0] sm:$0xff]  ;;  %v89_v1 = vld [vmem:[%s2470_s0 + $0x8] sm:$0xff]  ;;  %s1478_s8 = smov 17   ;;  %v222_v44 = vlaneseq }
  0x14   :  { %v90_v2 = vld [vmem:[%s2471_s1] sm:$0xff]  ;;  %130 = vmatpush.msra.mxu0 %v88_v0  ;;  %159 = vmatpush.msra.mxu1 %v89_v1  ;;  %v91_v3 = vld [vmem:[%s2471_s1 + $0x8] sm:$0xff]  ;;  %v92_v4 = vld [vmem:[%s2471_s1 + $0x10] sm:$0xff]  ;;  %s1479_s11 = smov 15   ;;  %s1480_s12 = smov 1   ;;  %vm642_vm9 = vcmask 261120  }
  0x15   :  { %1295 = vmatmul.msk.f32.vlgmr.msra.gmra.mxu0 %vm102_vm0, %v90_v2  ;;  %1299 = vmatmul.msk.f32.vlgmr.msra.gmra.mxu1 %vm102_vm0, %v90_v2  ;;  %v93_v5 = vld [vmem:[%s2471_s1 + $0x18] sm:$0xff]  ;;  %v94_v6 = vld [vmem:[#allocation2] sm:$0xff]  ;;  %v95_v7 = vld [vmem:[#allocation2 + $0x8] sm:$0xff]  ;;  %s1481_s13 = smov 127   ;;  %s1482_s14 = smov 113   ;;  %v1673_v48 = vand.u32 127, %v222_v44 }
  0x16   :  { %v96_v16 = vld [vmem:[#allocation2 + $0x10] sm:$0xff]  ;;  %v97_v20 = vld [vmem:[#allocation2 + $0x18] sm:$0xff]  ;;  %s1483_s3 = smov 112   ;;  %v98_v26 = vld [vmem:[#allocation2 + $0x20] sm:$0xff]  ;;  %s1484_s2 = smov 111  }
  0x17   :  { %v99_v30 = vld [vmem:[#allocation2 + $0x28] sm:$0xff]  ;;  %v100_v37 = vld [vmem:[#allocation2 + $0x30] sm:$0xff]  ;;  %v101_v42 = vld [vmem:[#allocation2 + $0x38] sm:$0xff]  ;;  %vm224_vm1 = vcmp.lt.s32.totalorder %v1673_v48, 17  ;;  %vm323_vm2 = vcmp.lt.s32.totalorder %v1673_v48, 15  ;;  %vm273_vm3 = vcmp.lt.s32.totalorder %v1673_v48, 16 }
  0x18   :  { %v233_v56 = vld [vmem:[#allocation5] sm:$0xff]  ;;  %v234_v57 = vld [vmem:[#allocation5 + $0x8] sm:$0xff]  ;;  %vm373_vm4 = vcmp.lt.s32.totalorder %v1673_v48, 1  ;;  %vm473_vm5 = vcmp.lt.s32.totalorder %v1673_v48, 113  ;;  %vm423_vm6 = vcmp.lt.s32.totalorder %v1673_v48, 127  ;;  %vm523_vm7 = vcmp.lt.s32.totalorder %v1673_v48, 112 }
  0x19   :  { %v190_v58 = vld [vmem:[#allocation5 + $0x100] sm:$0xff]  ;;  %v191_v59 = vld [vmem:[#allocation5 + $0x108] sm:$0xff]  ;;  %vm573_vm8 = vcmp.lt.s32.totalorder %v1673_v48, 111 }
  0x1a   :  { %v283_v63 = vld [vmem:[#allocation5 + $0x40] sm:$0xff]  ;;  %v284_v0 = vld [vmem:[#allocation5 + $0x48] sm:$0xff] }
  0x1b   :  { %v483_v44 = vld [vmem:[#allocation5 + $0x180] sm:$0xff] }
  0x1d   :  { %1296 = vmatmul.msk.f32.gmra.mxu0 %vm102_vm0, %v91_v3  ;;  %1300 = vmatmul.msk.f32.gmra.mxu1 %vm102_vm0, %v91_v3 }
  0x25   :  { %1297 = vmatmul.msk.f32.gmra.mxu0 %vm102_vm0, %v92_v4  ;;  %1301 = vmatmul.msk.f32.gmra.mxu1 %vm102_vm0, %v92_v4 }
  0x2d   :  { %1298 = vmatmul.msk.f32.gmra.mxu0 %vm102_vm0, %v93_v5  ;;  %1302 = vmatmul.msk.f32.gmra.mxu1 %vm102_vm0, %v93_v5 }
  0x92   :  { %v132_v8 = vpop.f32.mrf.mxu0  ;;  %v161_v9 = vpop.f32.mrf.mxu1 }
  0x93   :  { %v133_v10 = vadd.f32 %v132_v8, %v94_v6  ;;  %v162_v11 = vadd.f32 %v161_v9, %v95_v7  ;;  %v333_v7 = vld [vmem:[#allocation5 + $0x80] sm:$0xff]  ;;  %v334_v8 = vld [vmem:[#allocation5 + $0x88] sm:$0xff] }
  0x95   :  { %v173_v12 = vmax.f32 %v133_v10, 0.0  ;;  %v174_v13 = vmax.f32 %v162_v11, 0.0 }
  0x97   :  { %v1573_v14 = vmin.f32 %v173_v12, 6.0  ;;  %v1575_v15 = vmin.f32 %v174_v13, 6.0 }
  0x99   :  { %214 = vrot.lane.b32.xlu1 %v1575_v15, %s1478_s8  ;;  %257 = vrot.lane.b32.xlu2 %v1573_v14, %s1474_s10  ;;  %v199_v1 = vmul.f32 %v191_v59, %v1575_v15  ;;  %v198_v2 = vmul.f32 %v190_v58, %v1573_v14 }
  0x9a   :  { %206 = vrot.lane.b32.xlu0 %v1573_v14, %s1478_s8  ;;  %v135_v17 = vpop.f32.mrf.mxu0  ;;  %v164_v21 = vpop.f32.mrf.mxu1 }
  0x9b   :  { %v136_v18 = vadd.f32 %v135_v17, %v96_v16  ;;  %v165_v22 = vadd.f32 %v164_v21, %v97_v20 }
  0x9d   :  { %v175_v19 = vmax.f32 %v136_v18, 0.0  ;;  %v176_v24 = vmax.f32 %v165_v22, 0.0 }
  0x9f   :  { %v1601_v23 = vmin.f32 %v175_v19, 6.0  ;;  %v1609_v25 = vmin.f32 %v176_v24, 6.0 }
  0xa1   :  { %307 = vrot.lane.b32.xlu1 %v1573_v14, %s1479_s11  ;;  %315 = vrot.lane.b32.xlu2 %v1575_v15, %s1479_s11 }
  0xa2   :  { %265 = vrot.lane.b32.xlu0 %v1575_v15, %s1474_s10  ;;  %v138_v27 = vpop.f32.mrf.mxu0  ;;  %v167_v31 = vpop.f32.mrf.mxu1 }
  0xa3   :  { %v139_v28 = vadd.f32 %v138_v27, %v98_v26  ;;  %v168_v33 = vadd.f32 %v167_v31, %v99_v30  ;;  %v383_v26 = vld [vmem:[#allocation5 + $0xc0] sm:$0xff]  ;;  %v384_v27 = vld [vmem:[#allocation5 + $0xc8] sm:$0xff] }
  0xa5   :  { %v177_v29 = vmax.f32 %v139_v28, 0.0  ;;  %v178_v34 = vmax.f32 %v168_v33, 0.0 }
  0xa7   :  { %v1635_v32 = vmin.f32 %v177_v29, 6.0  ;;  %v1643_v35 = vmin.f32 %v178_v34, 6.0 }
  0xa9   :  { %365 = vrot.lane.b32.xlu1 %v1575_v15, %s1480_s12  ;;  %407 = vrot.lane.b32.xlu2 %v1573_v14, %s1481_s13 }
  0xaa   :  { %357 = vrot.lane.b32.xlu0 %v1573_v14, %s1480_s12  ;;  %v141_v38 = vpop.f32.mrf.mxu0  ;;  %v170_v43 = vpop.f32.mrf.mxu1 }
  0xab   :  { %v142_v40 = vadd.f32 %v141_v38, %v100_v37  ;;  %v171_v47 = vadd.f32 %v170_v43, %v101_v42 }
  0xad   :  { %v179_v41 = vmax.f32 %v142_v40, 0.0  ;;  %v180_v49 = vmax.f32 %v171_v47, 0.0  ;;  %v434_v40 = vld [vmem:[#allocation5 + $0x148] sm:$0xff] }
  0xae   :  { %v484_v47 = vld [vmem:[#allocation5 + $0x188] sm:$0xff] }
  0xaf   :  { %v1671_v46 = vmin.f32 %v179_v41, 6.0  ;;  %v1684_v53 = vmin.f32 %v180_v49, 6.0 }
  0xb1   :  { %457 = vrot.lane.b32.xlu1 %v1573_v14, %s1482_s14  ;;  %465 = vrot.lane.b32.xlu2 %v1575_v15, %s1482_s14 }
  0xb2   :  { %415 = vrot.lane.b32.xlu0 %v1575_v15, %s1481_s13 }
  0xb9   :  { %507 = vrot.lane.b32.xlu1 %v1573_v14, %s1483_s3  ;;  %515 = vrot.lane.b32.xlu2 %v1575_v15, %s1483_s3 }
  0xba   :  { %208 = vrot.lane.b32.xlu0 %v1601_v23, %s1478_s8 }
  0xc1   :  { %216 = vrot.lane.b32.xlu1 %v1609_v25, %s1478_s8  ;;  %259 = vrot.lane.b32.xlu2 %v1601_v23, %s1474_s10 }
  0xc2   :  { %267 = vrot.lane.b32.xlu0 %v1609_v25, %s1474_s10 }
  0xc9   :  { %309 = vrot.lane.b32.xlu1 %v1601_v23, %s1479_s11  ;;  %317 = vrot.lane.b32.xlu2 %v1609_v25, %s1479_s11 }
  0xca   :  { %359 = vrot.lane.b32.xlu0 %v1601_v23, %s1480_s12 }
  0xd1   :  { %367 = vrot.lane.b32.xlu1 %v1609_v25, %s1480_s12  ;;  %409 = vrot.lane.b32.xlu2 %v1601_v23, %s1481_s13 }
  0xd2   :  { %417 = vrot.lane.b32.xlu0 %v1609_v25, %s1481_s13 }
  0xd9   :  { %459 = vrot.lane.b32.xlu1 %v1601_v23, %s1482_s14  ;;  %467 = vrot.lane.b32.xlu2 %v1609_v25, %s1482_s14 }
  0xda   :  { %509 = vrot.lane.b32.xlu0 %v1601_v23, %s1483_s3 }
  0xe1   :  { %517 = vrot.lane.b32.xlu1 %v1609_v25, %s1483_s3  ;;  %261 = vrot.lane.b32.xlu2 %v1635_v32, %s1474_s10 }
  0xe2   :  { %559 = vrot.lane.b32.xlu0 %v1601_v23, %s1484_s2 }
  0xe9   :  { %210 = vrot.lane.b32.xlu1 %v1635_v32, %s1478_s8  ;;  %319 = vrot.lane.b32.xlu2 %v1643_v35, %s1479_s11 }
  0xea   :  { %269 = vrot.lane.b32.xlu0 %v1643_v35, %s1474_s10 }
  0xf1   :  { %218 = vrot.lane.b32.xlu1 %v1643_v35, %s1478_s8  ;;  %411 = vrot.lane.b32.xlu2 %v1635_v32, %s1481_s13 }
  0xf2   :  { %361 = vrot.lane.b32.xlu0 %v1635_v32, %s1480_s12 }
  0xf3   :  { %v258_v36 = vpop.permute.xlu2 %257 }
  0xf9   :  { %311 = vrot.lane.b32.xlu1 %v1635_v32, %s1479_s11  ;;  %469 = vrot.lane.b32.xlu2 %v1643_v35, %s1482_s14 }
  0xfa   :  { %419 = vrot.lane.b32.xlu0 %v1643_v35, %s1481_s13 }
  0xfb   :  { %v316_v39 = vpop.permute.xlu2 %315 }
 0x101   :  { %369 = vrot.lane.b32.xlu1 %v1643_v35, %s1480_s12  ;;  %561 = vrot.lane.b32.xlu2 %v1635_v32, %s1484_s2 }
 0x102   :  { %511 = vrot.lane.b32.xlu0 %v1635_v32, %s1483_s3 }
 0x103   :  { %v1669_v45 = vpop.permute.xlu2 %407 }
 0x109   :  { %461 = vrot.lane.b32.xlu1 %v1635_v32, %s1482_s14  ;;  %263 = vrot.lane.b32.xlu2 %v1671_v46, %s1474_s10 }
 0x10a   :  { %569 = vrot.lane.b32.xlu0 %v1643_v35, %s1484_s2 }
 0x10b   :  { %v215_v50 = vpop.permute.xlu1 %214  ;;  %v1682_v51 = vpop.permute.xlu2 %465 }
 0x10c   :  { %v207_v52 = vpop.permute.xlu0 %206 }
 0x10d   :  { %v225_v54 = vsel %vm224_vm1, %v207_v52, %v215_v50  ;;  %v229_v55 = vsel %vm224_vm1, %v215_v50, %v207_v52 }
 0x10e   :  { %v241_v60 = vmul.f32 %v233_v56, %v229_v55  ;;  %v242_v61 = vmul.f32 %v234_v57, %v225_v54 }
 0x110   :  { %v249_v11 = vadd.f32 %v241_v60, %v198_v2  ;;  %v250_v12 = vadd.f32 %v242_v61, %v199_v1 }
 0x111   :  { %519 = vrot.lane.b32.xlu1 %v1643_v35, %s1483_s3  ;;  %271 = vrot.lane.b32.xlu2 %v1684_v53, %s1474_s10 }
 0x112   :  { %212 = vrot.lane.b32.xlu0 %v1671_v46, %s1478_s8 }
 0x113   :  { %v308_v62 = vpop.permute.xlu1 %307  ;;  %v1704_v5 = vpop.permute.xlu2 %515 }
 0x114   :  { %v324_v3 = vsel %vm323_vm2, %v308_v62, %v316_v39  ;;  %v328_v4 = vsel %vm323_vm2, %v316_v39, %v308_v62  ;;  %v266_v6 = vpop.permute.xlu0 %265  ;;  %v433_v39 = vld [vmem:[#allocation5 + $0x140] sm:$0xff] }
 0x115   :  { %v274_v9 = vsel %vm273_vm3, %v258_v36, %v266_v6  ;;  %v278_v10 = vsel %vm273_vm3, %v266_v6, %v258_v36  ;;  %v341_v17 = vmul.f32 %v333_v7, %v328_v4  ;;  %v342_v18 = vmul.f32 %v334_v8, %v324_v3  ;;  %v192_v7 = vld [vmem:[#allocation5 + $0x110] sm:$0xff]  ;;  %v193_v8 = vld [vmem:[#allocation5 + $0x118] sm:$0xff] }
 0x116   :  { %v291_v13 = vmul.f32 %v283_v63, %v278_v10  ;;  %v292_v16 = vmul.f32 %v284_v0, %v274_v9  ;;  %v1768_v10 = vld [vmem:[#allocation5 + $0x18] sm:$0xff] }
 0x118   :  { %v299_v19 = vadd.f32 %v291_v13, %v249_v11  ;;  %v300_v20 = vadd.f32 %v292_v16, %v250_v12  ;;  %v200_v12 = vmul.f32 %v192_v7, %v1601_v23  ;;  %v201_v13 = vmul.f32 %v193_v8, %v1609_v25 }
 0x119   :  { %313 = vrot.lane.b32.xlu1 %v1671_v46, %s1479_s11  ;;  %321 = vrot.lane.b32.xlu2 %v1684_v53, %s1479_s11 }
 0x11a   :  { %220 = vrot.lane.b32.xlu0 %v1684_v53, %s1478_s8  ;;  %v350_v21 = vadd.f32 %v342_v18, %v300_v20  ;;  %v349_v22 = vadd.f32 %v341_v17, %v299_v19  ;;  %v1776_v18 = vld [vmem:[#allocation5 + $0x50] sm:$0xff]  ;;  %v1778_v19 = vld [vmem:[#allocation5 + $0x58] sm:$0xff] }
 0x11b   :  { %v366_v24 = vpop.permute.xlu1 %365  ;;  %v1721_v31 = vpop.permute.xlu2 %259 }
 0x11c   :  { %v358_v28 = vpop.permute.xlu0 %357 }
 0x11d   :  { %v374_v29 = vsel %vm373_vm4, %v358_v28, %v366_v24  ;;  %v378_v30 = vsel %vm373_vm4, %v366_v24, %v358_v28 }
 0x11e   :  { %v391_v33 = vmul.f32 %v383_v26, %v378_v30  ;;  %v392_v34 = vmul.f32 %v384_v27, %v374_v29 }
 0x120   :  { %v399_v36 = vadd.f32 %v391_v33, %v349_v22  ;;  %v400_v37 = vadd.f32 %v392_v34, %v350_v21  ;;  %v1796_v34 = vld [vmem:[#allocation5 + $0x90] sm:$0xff] }
 0x121   :  { %371 = vrot.lane.b32.xlu1 %v1684_v53, %s1480_s12  ;;  %413 = vrot.lane.b32.xlu2 %v1671_v46, %s1481_s13 }
 0x122   :  { %363 = vrot.lane.b32.xlu0 %v1671_v46, %s1480_s12 }
 0x123   :  { %v458_v38 = vpop.permute.xlu1 %457  ;;  %v318_v57 = vpop.permute.xlu2 %317 }
 0x124   :  { %v474_v41 = vsel %vm473_vm5, %v458_v38, %v1682_v51  ;;  %v478_v42 = vsel %vm473_vm5, %v1682_v51, %v458_v38  ;;  %v416_v43 = vpop.permute.xlu0 %415  ;;  %v533_v51 = vld [vmem:[#allocation5 + $0x1c0] sm:$0xff] }
 0x125   :  { %v424_v49 = vsel %vm423_vm6, %v1669_v45, %v416_v43  ;;  %v428_v50 = vsel %vm423_vm6, %v416_v43, %v1669_v45  ;;  %v491_v55 = vmul.f32 %v483_v44, %v474_v41  ;;  %v492_v56 = vmul.f32 %v484_v47, %v478_v42  ;;  %v534_v45 = vld [vmem:[#allocation5 + $0x1c8] sm:$0xff]  ;;  %v1808_v43 = vld [vmem:[#allocation5 + $0xd0] sm:$0xff]  ;;  %v1810_v44 = vld [vmem:[#allocation5 + $0xd8] sm:$0xff] }
 0x126   :  { %v441_v52 = vmul.f32 %v433_v39, %v424_v49  ;;  %v442_v54 = vmul.f32 %v434_v40, %v428_v50 }
 0x128   :  { %v449_v58 = vadd.f32 %v441_v52, %v399_v36  ;;  %v450_v59 = vadd.f32 %v442_v54, %v400_v37  ;;  %v1816_v52 = vld [vmem:[#allocation5 + $0x150] sm:$0xff]  ;;  %v1818_v54 = vld [vmem:[#allocation5 + $0x158] sm:$0xff] }
 0x129   :  { %463 = vrot.lane.b32.xlu1 %v1671_v46, %s1482_s14  ;;  %471 = vrot.lane.b32.xlu2 %v1684_v53, %s1482_s14 }
 0x12a   :  { %421 = vrot.lane.b32.xlu0 %v1684_v53, %s1481_s13  ;;  %v499_v60 = vadd.f32 %v491_v55, %v449_v58  ;;  %v500_v61 = vadd.f32 %v492_v56, %v450_v59 }
 0x12b   :  { %v508_v62 = vpop.permute.xlu1 %507  ;;  %v410_v9 = vpop.permute.xlu2 %409 }
 0x12c   :  { %v524_v63 = vsel %vm523_vm7, %v508_v62, %v1704_v5  ;;  %v528_v0 = vsel %vm523_vm7, %v1704_v5, %v508_v62  ;;  %v209_v1 = vpop.permute.xlu0 %208  ;;  %v1766_v5 = vld [vmem:[#allocation5 + $0x10] sm:$0xff] }
 0x12d   :  { %v541_v2 = vmul.f32 %v533_v51, %v524_v63  ;;  %v542_v3 = vmul.f32 %v534_v45, %v528_v0  ;;  %v1828_v0 = vld [vmem:[#allocation5 + $0x190] sm:$0xff] }
 0x12f   :  { %v1756_v4 = vadd.f32 %v541_v2, %v499_v60  ;;  %v1758_v6 = vadd.f32 %v542_v3, %v500_v61 }
 0x131   :  { %521 = vrot.lane.b32.xlu1 %v1684_v53, %s1483_s3  ;;  %563 = vrot.lane.b32.xlu2 %v1671_v46, %s1484_s2 }
 0x132   :  { %513 = vrot.lane.b32.xlu0 %v1671_v46, %s1483_s3 }
 0x133   :  { %v217_v11 = vpop.permute.xlu1 %216  ;;  %v468_v37 = vpop.permute.xlu2 %467 }
 0x134   :  { %v226_v16 = vsel %vm224_vm1, %v209_v1, %v217_v11  ;;  %v230_v17 = vsel %vm224_vm1, %v217_v11, %v209_v1  ;;  %v268_v20 = vpop.permute.xlu0 %267  ;;  %v1830_v1 = vld [vmem:[#allocation5 + $0x198] sm:$0xff] }
 0x135   :  { %v243_v21 = vmul.f32 %v1766_v5, %v230_v17  ;;  %v244_v22 = vmul.f32 %v1768_v10, %v226_v16  ;;  %v275_v23 = vsel %vm273_vm3, %v1721_v31, %v268_v20  ;;  %v279_v24 = vsel %vm273_vm3, %v268_v20, %v1721_v31  ;;  %v1798_v31 = vld [vmem:[#allocation5 + $0x98] sm:$0xff]  ;;  %v1838_v17 = vld [vmem:[#allocation5 + $0x1d0] sm:$0xff] }
 0x136   :  { %v293_v28 = vmul.f32 %v1776_v18, %v279_v24  ;;  %v294_v29 = vmul.f32 %v1778_v19, %v275_v23  ;;  %v1840_v20 = vld [vmem:[#allocation5 + $0x1d8] sm:$0xff] }
 0x137   :  { %v251_v26 = vadd.f32 %v243_v21, %v200_v12  ;;  %v252_v27 = vadd.f32 %v244_v22, %v201_v13 }
 0x139   :  { %v301_v30 = vadd.f32 %v293_v28, %v251_v26  ;;  %v302_v33 = vadd.f32 %v294_v29, %v252_v27  ;;  %567 = vrot.lane.b32.xlu1 %v1609_v25, %s1484_s2  ;;  %557 = vrot.lane.b32.xlu2 %v1573_v14, %s1484_s2 }
 0x13a   :  { %571 = vrot.lane.b32.xlu0 %v1684_v53, %s1484_s2 }
 0x13b   :  { %v310_v36 = vpop.permute.xlu1 %309  ;;  %v262_v59 = vpop.permute.xlu2 %261 }
 0x13c   :  { %v325_v38 = vsel %vm323_vm2, %v310_v36, %v318_v57  ;;  %v329_v39 = vsel %vm323_vm2, %v318_v57, %v310_v36  ;;  %v360_v40 = vpop.permute.xlu0 %359 }
 0x13d   :  { %v343_v25 = vmul.f32 %v1796_v34, %v329_v39  ;;  %v344_v14 = vmul.f32 %v1798_v31, %v325_v38  ;;  %v1860_v39 = vld [vmem:[#allocation5 + $0x128] sm:$0xff] }
 0x13e   :  { %2498 = vst [vmem:[#allocation15_spill] sm:$0xff] %v1860_v39 }
 0x13f   :  { %v351_v41 = vadd.f32 %v343_v25, %v301_v30  ;;  %v352_v42 = vadd.f32 %v344_v14, %v302_v33  ;;  %v1864_v25 = vld [vmem:[#allocation5 + $0x20] sm:$0xff]  ;;  %v1866_v14 = vld [vmem:[#allocation5 + $0x28] sm:$0xff] }
 0x140   :  { %2499 = vst [vmem:[#allocation16_spill] sm:$0xff] %v1866_v14 }
 0x142   :  { %565 = vrot.lane.b32.xlu0 %v1575_v15, %s1484_s2 }
 0x143   :  { %v368_v47 = vpop.permute.xlu1 %367  ;;  %v320_v16 = vpop.permute.xlu2 %319 }
 0x144   :  { %v375_v49 = vsel %vm373_vm4, %v360_v40, %v368_v47  ;;  %v379_v50 = vsel %vm373_vm4, %v368_v47, %v360_v40  ;;  %v418_v55 = vpop.permute.xlu0 %417  ;;  %v1862_v40 = vld [vmem:[#allocation5 + $0x120] sm:$0xff] }
 0x145   :  { %v393_v56 = vmul.f32 %v1808_v43, %v379_v50  ;;  %v394_v15 = vmul.f32 %v1810_v44, %v375_v49  ;;  %v425_v57 = vsel %vm423_vm6, %v410_v9, %v418_v55  ;;  %v429_v58 = vsel %vm423_vm6, %v418_v55, %v410_v9  ;;  %v287_v47 = vld [vmem:[#allocation5 + $0x60] sm:$0xff]  ;;  %v288_v49 = vld [vmem:[#allocation5 + $0x68] sm:$0xff] }
 0x146   :  { %v443_v60 = vmul.f32 %v1816_v52, %v425_v57  ;;  %v444_v61 = vmul.f32 %v1818_v54, %v429_v58  ;;  %v203_v57 = vmul.f32 %v1860_v39, %v1643_v35  ;;  %v1935_v39 = vld [vmem:[#allocation5 + $0x1e8] sm:$0xff] }
 0x147   :  { %v401_v51 = vadd.f32 %v393_v56, %v351_v41  ;;  %v402_v45 = vadd.f32 %v394_v15, %v352_v42  ;;  %v202_v15 = vmul.f32 %v1862_v40, %v1635_v32 }
 0x149   :  { %v451_v62 = vadd.f32 %v443_v60, %v401_v51  ;;  %v452_v63 = vadd.f32 %v444_v61, %v402_v45 }
 0x14b   :  { %v460_v2 = vpop.permute.xlu1 %459  ;;  %v1854_v30 = vpop.permute.xlu2 %411 }
 0x14c   :  { %v475_v3 = vsel %vm473_vm5, %v460_v2, %v468_v37  ;;  %v479_v7 = vsel %vm473_vm5, %v468_v37, %v460_v2  ;;  %v510_v8 = vpop.permute.xlu0 %509  ;;  %v1880_v2 = vld [vmem:[#allocation5 + $0xa0] sm:$0xff] }
 0x14d   :  { %v493_v9 = vmul.f32 %v1828_v0, %v475_v3  ;;  %v494_v11 = vmul.f32 %v1830_v1, %v479_v7  ;;  %2500 = vst [vmem:[#allocation17_spill] sm:$0xff] %v1880_v2  ;;  %v1882_v3 = vld [vmem:[#allocation5 + $0xa8] sm:$0xff] }
 0x14e   :  { %2501 = vst [vmem:[#allocation18_spill] sm:$0xff] %v1882_v3 }
 0x14f   :  { %v501_v12 = vadd.f32 %v493_v9, %v451_v62  ;;  %v502_v13 = vadd.f32 %v494_v11, %v452_v63 }
 0x153   :  { %v518_v21 = vpop.permute.xlu1 %517  ;;  %v1868_v42 = vpop.permute.xlu2 %469 }
 0x154   :  { %v525_v22 = vsel %vm523_vm7, %v510_v8, %v518_v21  ;;  %v529_v23 = vsel %vm523_vm7, %v518_v21, %v510_v8  ;;  %v1846_v24 = vpop.permute.xlu0 %559 }
 0x155   :  { %v543_v26 = vmul.f32 %v1838_v17, %v525_v22  ;;  %v544_v27 = vmul.f32 %v1840_v20, %v529_v23  ;;  %v387_v22 = vld [vmem:[#allocation5 + $0xe0] sm:$0xff]  ;;  %v388_v23 = vld [vmem:[#allocation5 + $0xe8] sm:$0xff] }
 0x157   :  { %v1850_v28 = vadd.f32 %v543_v26, %v501_v12  ;;  %v1852_v29 = vadd.f32 %v544_v27, %v502_v13 }
 0x15b   :  { %v211_v33 = vpop.permute.xlu1 %210  ;;  %v1890_v12 = vpop.permute.xlu2 %561 }
 0x15c   :  { %v270_v36 = vpop.permute.xlu0 %269 }
 0x15d   :  { %v276_v37 = vsel %vm273_vm3, %v262_v59, %v270_v36  ;;  %v280_v38 = vsel %vm273_vm3, %v270_v36, %v262_v59 }
 0x15e   :  { %v295_v51 = vmul.f32 %v287_v47, %v280_v38  ;;  %v296_v45 = vmul.f32 %v288_v49, %v276_v37 }
 0x163   :  { %v219_v41 = vpop.permute.xlu1 %218  ;;  %v264_v47 = vpop.permute.xlu2 %263 }
 0x164   :  { %v227_v50 = vsel %vm224_vm1, %v211_v33, %v219_v41  ;;  %v231_v55 = vsel %vm224_vm1, %v219_v41, %v211_v33  ;;  %v362_v56 = vpop.permute.xlu0 %361 }
 0x165   :  { %v245_v58 = vmul.f32 %v1864_v25, %v231_v55  ;;  %v246_v59 = vmul.f32 %v1866_v14, %v227_v50 }
 0x167   :  { %v253_v60 = vadd.f32 %v245_v58, %v202_v15  ;;  %v254_v61 = vadd.f32 %v246_v59, %v203_v57 }
 0x169   :  { %v303_v62 = vadd.f32 %v295_v51, %v253_v60  ;;  %v304_v63 = vadd.f32 %v296_v45, %v254_v61  ;;  %v1898_v61 = vld [vmem:[#allocation5 + $0x30] sm:$0xff] }
 0x16a   :  { %2502 = vst [vmem:[#allocation19_spill] sm:$0xff] %v1898_v61 }
 0x16b   :  { %v312_v7 = vpop.permute.xlu1 %311  ;;  %v272_v55 = vpop.permute.xlu2 %271 }
 0x16c   :  { %v326_v32 = vsel %vm323_vm2, %v312_v7, %v320_v16  ;;  %v330_v35 = vsel %vm323_vm2, %v320_v16, %v312_v7  ;;  %v420_v8 = vpop.permute.xlu0 %419 }
 0x16d   :  { %v345_v9 = vmul.f32 %v1880_v2, %v330_v35  ;;  %v346_v11 = vmul.f32 %v1882_v3, %v326_v32  ;;  %v1906_v32 = vld [vmem:[#allocation5 + $0x130] sm:$0xff]  ;;  %v1908_v35 = vld [vmem:[#allocation5 + $0x138] sm:$0xff]  ;;  %v1933_v2 = vld [vmem:[#allocation5 + $0x1e0] sm:$0xff] }
 0x16e   :  { %2504 = vst [vmem:[#allocation21_spill] sm:$0xff] %v1906_v32 }
 0x16f   :  { %v353_v13 = vadd.f32 %v345_v9, %v303_v62  ;;  %v354_v21 = vadd.f32 %v346_v11, %v304_v63  ;;  %2505 = vst [vmem:[#allocation22_spill] sm:$0xff] %v1908_v35 }
 0x173   :  { %v370_v26 = vpop.permute.xlu1 %369  ;;  %v322_v59 = vpop.permute.xlu2 %321 }
 0x174   :  { %v376_v27 = vsel %vm373_vm4, %v362_v56, %v370_v26  ;;  %v380_v33 = vsel %vm373_vm4, %v370_v26, %v362_v56  ;;  %v512_v36 = vpop.permute.xlu0 %511  ;;  %v1900_v56 = vld [vmem:[#allocation5 + $0x38] sm:$0xff]  ;;  %v277_v26 = vsel %vm273_vm3, %v264_v47, %v272_v55 }
 0x175   :  { %v395_v16 = vmul.f32 %v387_v22, %v380_v33  ;;  %v396_v37 = vmul.f32 %v388_v23, %v376_v27  ;;  %2503 = vst [vmem:[#allocation20_spill] sm:$0xff] %v1900_v56  ;;  %v205_v22 = vmul.f32 %v1908_v35, %v1684_v53  ;;  %v290_v23 = vld [vmem:[#allocation5 + $0x78] sm:$0xff]  ;;  %v281_v27 = vsel %vm273_vm3, %v272_v55, %v264_v47  ;;  %v437_v33 = vld [vmem:[#allocation5 + $0x160] sm:$0xff] }
 0x177   :  { %v403_v38 = vadd.f32 %v395_v16, %v353_v13  ;;  %v404_v41 = vadd.f32 %v396_v37, %v354_v21  ;;  %v289_v13 = vld [vmem:[#allocation5 + $0x70] sm:$0xff]  ;;  %v204_v21 = vmul.f32 %v1906_v32, %v1671_v46  ;;  %v438_v16 = vld [vmem:[#allocation5 + $0x168] sm:$0xff]  ;;  %v426_v37 = vsel %vm423_vm6, %v1854_v30, %v420_v8 }
 0x178   :  { %v430_v46 = vsel %vm423_vm6, %v420_v8, %v1854_v30  ;;  %v297_v32 = vmul.f32 %v289_v13, %v281_v27 }
 0x179   :  { %v446_v30 = vmul.f32 %v438_v16, %v430_v46 }
 0x17b   :  { %v462_v49 = vpop.permute.xlu1 %461  ;;  %v414_v7 = vpop.permute.xlu2 %413 }
 0x17c   :  { %v1896_v50 = vpop.permute.xlu0 %569  ;;  %v476_v53 = vsel %vm473_vm5, %v462_v49, %v1868_v42  ;;  %v480_v47 = vsel %vm473_vm5, %v1868_v42, %v462_v49  ;;  %v1941_v49 = vld [vmem:[#allocation5 + $0xb0] sm:$0xff] }
 0x183   :  { %v520_v15 = vpop.permute.xlu1 %519 }
 0x184   :  { %v213_v57 = vpop.permute.xlu0 %212  ;;  %v526_v14 = vsel %vm523_vm7, %v512_v36, %v520_v15  ;;  %v530_v42 = vsel %vm523_vm7, %v520_v15, %v512_v36  ;;  %v454_v36 = vadd.f32 %v446_v30, %v404_v41  ;;  %v472_v15 = vpop.permute.xlu2 %471  ;;  %v576_v30 = vsel %vm573_vm8, %v1890_v12, %v1896_v50 }
 0x185   :  { %v546_v46 = vmul.f32 %v1935_v39, %v530_v42  ;;  %v588_v42 = vld [vmem:[#allocation5 + $0x228] sm:$0xff] }
 0x18b   :  { %v314_v58 = vpop.permute.xlu1 %313 }
 0x18c   :  { %v221_v51 = vpop.permute.xlu0 %220  ;;  %v331_v13 = vsel %vm323_vm2, %v322_v59, %v314_v58 }
 0x18d   :  { %v228_v62 = vsel %vm224_vm1, %v213_v57, %v221_v51  ;;  %v232_v63 = vsel %vm224_vm1, %v221_v51, %v213_v57  ;;  %v487_v57 = vld [vmem:[#allocation5 + $0x1a0] sm:$0xff]  ;;  %v488_v51 = vld [vmem:[#allocation5 + $0x1a8] sm:$0xff] }
 0x18e   :  { %v247_v9 = vmul.f32 %v1898_v61, %v232_v63  ;;  %v248_v11 = vmul.f32 %v1900_v56, %v228_v62  ;;  %v298_v56 = vmul.f32 %v290_v23, %v277_v26  ;;  %v445_v61 = vmul.f32 %v437_v33, %v426_v37 }
 0x18f   :  { %v495_v8 = vmul.f32 %v487_v57, %v476_v53  ;;  %v496_v3 = vmul.f32 %v488_v51, %v480_v47  ;;  %v545_v37 = vmul.f32 %v1933_v2, %v526_v14  ;;  %v439_v57 = vld [vmem:[#allocation5 + $0x170] sm:$0xff]  ;;  %v440_v51 = vld [vmem:[#allocation5 + $0x178] sm:$0xff]  ;;  %v347_v53 = vmul.f32 %v1941_v49, %v331_v13 }
 0x190   :  { %v255_v62 = vadd.f32 %v247_v9, %v204_v21  ;;  %v256_v63 = vadd.f32 %v248_v11, %v205_v22  ;;  %v1943_v9 = vld [vmem:[#allocation5 + $0xb8] sm:$0xff]  ;;  %v327_v11 = vsel %vm323_vm2, %v314_v58, %v322_v59  ;;  %v389_v21 = vld [vmem:[#allocation5 + $0xf0] sm:$0xff]  ;;  %v453_v27 = vadd.f32 %v445_v61, %v403_v38 }
 0x191   :  { %v390_v22 = vld [vmem:[#allocation5 + $0xf8] sm:$0xff]  ;;  %v348_v38 = vmul.f32 %v1943_v9, %v327_v11  ;;  %v504_v61 = vadd.f32 %v496_v3, %v454_v36 }
 0x192   :  { %v305_v33 = vadd.f32 %v297_v32, %v255_v62  ;;  %v306_v16 = vadd.f32 %v298_v56, %v256_v63  ;;  %v540_v36 = vld [vmem:[#allocation5 + $0x1f8] sm:$0xff] }
 0x193   :  { %v372_v45 = vpop.permute.xlu1 %371  ;;  %v554_v3 = vadd.f32 %v546_v46, %v504_v61 }
 0x194   :  { %v364_v60 = vpop.permute.xlu0 %363  ;;  %v355_v14 = vadd.f32 %v347_v53, %v305_v33  ;;  %v356_v32 = vadd.f32 %v348_v38, %v306_v16  ;;  %v1977_v38 = vld [vmem:[#allocation5 + $0x210] sm:$0xff] }
 0x195   :  { %v377_v23 = vsel %vm373_vm4, %v364_v60, %v372_v45  ;;  %v381_v26 = vsel %vm373_vm4, %v372_v45, %v364_v60  ;;  %v503_v60 = vadd.f32 %v495_v8, %v453_v27  ;;  %v539_v27 = vld [vmem:[#allocation5 + $0x1f0] sm:$0xff] }
 0x196   :  { %v397_v41 = vmul.f32 %v389_v21, %v381_v26  ;;  %v398_v45 = vmul.f32 %v390_v22, %v377_v23  ;;  %v489_v21 = vld [vmem:[#allocation5 + $0x1b0] sm:$0xff]  ;;  %v490_v22 = vld [vmem:[#allocation5 + $0x1b8] sm:$0xff] }
 0x197   :  { %v553_v8 = vadd.f32 %v545_v37, %v503_v60 }
 0x198   :  { %v405_v11 = vadd.f32 %v397_v41, %v355_v14  ;;  %v406_v13 = vadd.f32 %v398_v45, %v356_v32  ;;  %v1981_v41 = vld [vmem:[#allocation5 + $0x230] sm:$0xff]  ;;  %v1983_v45 = vld [vmem:[#allocation5 + $0x238] sm:$0xff] }
 0x19b   :  { %v464_v55 = vpop.permute.xlu1 %463 }
 0x19c   :  { %v422_v35 = vpop.permute.xlu0 %421  ;;  %v477_v23 = vsel %vm473_vm5, %v464_v55, %v472_v15  ;;  %v481_v26 = vsel %vm473_vm5, %v472_v15, %v464_v55  ;;  %v1979_v55 = vld [vmem:[#allocation5 + $0x218] sm:$0xff] }
 0x19d   :  { %v427_v58 = vsel %vm423_vm6, %v414_v7, %v422_v35  ;;  %v431_v59 = vsel %vm423_vm6, %v422_v35, %v414_v7  ;;  %v580_v7 = vsel %vm573_vm8, %v1896_v50, %v1890_v12  ;;  %v587_v35 = vld [vmem:[#allocation5 + $0x220] sm:$0xff] }
 0x19e   :  { %v447_v47 = vmul.f32 %v439_v57, %v427_v58  ;;  %v448_v62 = vmul.f32 %v440_v51, %v431_v59  ;;  %v595_v37 = vmul.f32 %v587_v35, %v576_v30  ;;  %v596_v46 = vmul.f32 %v588_v42, %v580_v7  ;;  %v564_v57 = vpop.permute.xlu2 %563  ;;  %v1997_v42 = vld [vmem:[#allocation7 + $0x20] sm:$0xff] }
 0x19f   :  { %v497_v51 = vmul.f32 %v489_v21, %v477_v23  ;;  %v498_v58 = vmul.f32 %v490_v22, %v481_v26  ;;  %v2003_v21 = vld [vmem:[#allocation7 + $0x10] sm:$0xff]  ;;  %v2005_v22 = vld [vmem:[#allocation7 + $0x18] sm:$0xff] }
 0x1a0   :  { %v455_v50 = vadd.f32 %v447_v47, %v405_v11  ;;  %v456_v16 = vadd.f32 %v448_v62, %v406_v13  ;;  %v603_v60 = vadd.f32 %v595_v37, %v553_v8  ;;  %v604_v61 = vadd.f32 %v596_v46, %v554_v3  ;;  %v1999_v8 = vld [vmem:[#allocation7 + $0x28] sm:$0xff]  ;;  %v2007_v23 = vld [vmem:[#allocation7 + $0x30] sm:$0xff]  ;;  %v2009_v26 = vld [vmem:[#allocation7 + $0x38] sm:$0xff] }
 0x1a1   :  { %2506 = vst [vmem:[#allocation23_spill] sm:$0xff] %v2007_v23 }
 0x1a2   :  { %v506_v14 = vadd.f32 %v498_v58, %v456_v16  ;;  %2507 = vst [vmem:[#allocation24_spill] sm:$0xff] %v2009_v26  ;;  %v620_v16 = vadd.f32 %v1999_v8, %v604_v61  ;;  %v2019_v58 = vld [vmem:[#allocation5 + $0x200] sm:$0xff] }
 0x1a3   :  { %v522_v56 = vpop.permute.xlu1 %521  ;;  %2508 = vst [vmem:[#allocation25_spill] sm:$0xff] %v2019_v58 }
 0x1a4   :  { %v514_v63 = vpop.permute.xlu0 %513 }
 0x1a5   :  { %v527_v33 = vsel %vm523_vm7, %v514_v63, %v522_v56  ;;  %v531_v12 = vsel %vm523_vm7, %v522_v56, %v514_v63  ;;  %v505_v56 = vadd.f32 %v497_v51, %v455_v50  ;;  %v619_v50 = vadd.f32 %v1997_v42, %v603_v60 }
 0x1a6   :  { %v547_v59 = vmul.f32 %v539_v27, %v527_v33  ;;  %v548_v53 = vmul.f32 %v540_v36, %v531_v12  ;;  %v628_v60 = vmax.f32 %v620_v16, 0.0 }
 0x1a8   :  { %v555_v3 = vadd.f32 %v547_v59, %v505_v56  ;;  %v556_v11 = vadd.f32 %v548_v53, %v506_v14  ;;  %v2021_v59 = vld [vmem:[#allocation5 + $0x208] sm:$0xff]  ;;  %v627_v56 = vmax.f32 %v619_v50, 0.0 }
 0x1a9   :  { %2509 = vst [vmem:[#allocation26_spill] sm:$0xff] %v2021_v59 }
 0x1ab   :  { %v568_v15 = vpop.permute.xlu1 %567 }
 0x1ac   :  { %v575_v32 = vsel %vm573_vm8, %v1846_v24, %v568_v15  ;;  %v579_v47 = vsel %vm573_vm8, %v568_v15, %v1846_v24  ;;  %v572_v62 = vpop.permute.xlu0 %571 }
 0x1ad   :  { %v593_v63 = vmul.f32 %v1977_v38, %v575_v32  ;;  %v594_v30 = vmul.f32 %v1979_v55, %v579_v47  ;;  %v577_v7 = vsel %vm573_vm8, %v564_v57, %v572_v62  ;;  %v581_v35 = vsel %vm573_vm8, %v572_v62, %v564_v57 }
 0x1ae   :  { %v597_v13 = vmul.f32 %v1981_v41, %v577_v7  ;;  %v598_v24 = vmul.f32 %v1983_v45, %v581_v35  ;;  %v2029_v35 = vld [vmem:[#allocation7] sm:$0xff] }
 0x1af   :  { %v601_v27 = vadd.f32 %v593_v63, %v1850_v28  ;;  %v602_v36 = vadd.f32 %v594_v30, %v1852_v29  ;;  %v558_v28 = vpop.permute.xlu2 %557  ;;  %2510 = vst [vmem:[#allocation27_spill] sm:$0xff] %v2029_v35 }
 0x1b0   :  { %v605_v33 = vadd.f32 %v597_v13, %v555_v3  ;;  %v606_v12 = vadd.f32 %v598_v24, %v556_v11  ;;  %v2031_v3 = vld [vmem:[#allocation7 + $0x8] sm:$0xff]  ;;  %v635_v11 = vmin.f32 %v627_v56, 6.0  ;;  %v636_v13 = vmin.f32 %v628_v60, 6.0  ;;  %v2078_v56 = vld [vmem:[#allocation8] sm:$0xff] }
 0x1b1   :  { %v617_v37 = vadd.f32 %v2003_v21, %v601_v27  ;;  %v618_v46 = vadd.f32 %v2005_v22, %v602_v36  ;;  %2511 = vst [vmem:[#allocation28_spill] sm:$0xff] %v2031_v3  ;;  %v2080_v60 = vld [vmem:[#allocation8 + $0x8] sm:$0xff] }
 0x1b2   :  { %v621_v57 = vadd.f32 %v2007_v23, %v605_v33  ;;  %v622_v51 = vadd.f32 %v2009_v26, %v606_v12  ;;  %2515 = vst [vmem:[#allocation32_spill] sm:$0xff] %v2078_v56 }
 0x1b3   :  { %v625_v32 = vmax.f32 %v617_v37, 0.0  ;;  %v626_v47 = vmax.f32 %v618_v46, 0.0  ;;  %2516 = vst [vmem:[#allocation33_spill] sm:$0xff] %v2080_v60 }
 0x1b4   :  { %v566_v29 = vpop.permute.xlu0 %565  ;;  %v629_v53 = vmax.f32 %v621_v57, 0.0  ;;  %v630_v15 = vmax.f32 %v622_v51, 0.0  ;;  %v2050_v51 = vld [vmem:[%s2470_s0 + $0x18] sm:$0xff] }
 0x1b5   :  { %v574_v61 = vsel %vm573_vm8, %v558_v28, %v566_v29  ;;  %v578_v14 = vsel %vm573_vm8, %v566_v29, %v558_v28  ;;  %v633_v36 = vmin.f32 %v625_v32, 6.0  ;;  %v634_v33 = vmin.f32 %v626_v47, 6.0  ;;  %2514 = vst [vmem:[#allocation31_spill] sm:$0xff] %v2050_v51  ;;  %v693_v28 = vld [vmem:[%s2471_s1] sm:$0xff]  ;;  %v694_v29 = vld [vmem:[%s2471_s1 + $0x8] sm:$0xff] }
 0x1b6   :  { %v591_v62 = vmul.f32 %v2019_v58, %v574_v61  ;;  %v592_v63 = vmul.f32 %v2021_v59, %v578_v14  ;;  %v637_v30 = vmin.f32 %v629_v53, 6.0  ;;  %v638_v7 = vmin.f32 %v630_v15, 6.0  ;;  %v695_v53 = vld [vmem:[%s2471_s1 + $0x10] sm:$0xff]  ;;  %v696_v15 = vld [vmem:[%s2471_s1 + $0x18] sm:$0xff] }
 0x1b8   :  { %658 = vmatpush.msra.mxu2 %v637_v30  ;;  %678 = vmatpush.msra.mxu3 %v638_v7  ;;  %v599_v24 = vadd.f32 %v591_v62, %v1756_v4  ;;  %v600_v27 = vadd.f32 %v592_v63, %v1758_v6  ;;  %v2040_v4 = vld [vmem:[%s2475_s5] sm:$0xff]  ;;  %v2045_v6 = vld [vmem:[%s2470_s0 + $0x10] sm:$0xff]  ;;  %v1332_v30 = vld [vmem:[%s2470_s0 + $0x8] sm:$0xff] }
 0x1b9   :  { %2512 = vst [vmem:[#allocation29_spill] sm:$0xff] %v2040_v4  ;;  %v1331_v62 = vld [vmem:[%s2470_s0] sm:$0xff]  ;;  %s1485_s0 = smov [#allocation10]  }
 0x1ba   :  { %659 = vmatpush.msra.mxu2 %v635_v11  ;;  %679 = vmatpush.msra.mxu3 %v636_v13  ;;  %v615_v12 = vadd.f32 %v2029_v35, %v599_v24  ;;  %v616_v50 = vadd.f32 %v2031_v3, %v600_v27  ;;  %2513 = vst [vmem:[#allocation30_spill] sm:$0xff] %v2045_v6  ;;  %v697_v11 = vld [vmem:[#allocation2] sm:$0xff]  ;;  %v698_v13 = vld [vmem:[#allocation2 + $0x8] sm:$0xff]  ;;  %s1278_s29 = sshll.u32 %s1485_s0, 4  ;;  %s1279_s29 = int_to_ptr.vmem [resolvable:$true] %s1278_s29 }
 0x1bc   :  { %660 = vmatpush.msra.mxu2 %v633_v36  ;;  %680 = vmatpush.msra.mxu3 %v634_v33  ;;  %v623_v16 = vmax.f32 %v615_v12, 0.0  ;;  %v624_v37 = vmax.f32 %v616_v50, 0.0 }
 0x1be   :  { %v631_v46 = vmin.f32 %v623_v16, 6.0  ;;  %v632_v57 = vmin.f32 %v624_v37, 6.0 }
 0x1c0   :  { %661 = vmatpush.msra.mxu2 %v631_v46  ;;  %681 = vmatpush.msra.mxu3 %v632_v57  ;;  %v699_v46 = vld [vmem:[#allocation2 + $0x10] sm:$0xff] }
 0x1c1   :  { %1303 = vmatmul.msk.f32.vlgmr.msra.gmra.mxu2 %vm642_vm9, %v2040_v4  ;;  %1304 = vmatmul.msk.f32.vlgmr.msra.gmra.mxu3 %vm642_vm9, %v2040_v4 }
 0x1c2   :  { %732 = vmatpush.msrb.mxu2 %v2045_v6  ;;  %761 = vmatpush.msrb.mxu3 %v2050_v51  ;;  %v879_v51 = vld [vmem:[#allocation5 + $0x40] sm:$0xff] }
 0x1c9   :  { %1307 = vmatmul.msk.f32.vlgmr.msrb.gmra.mxu2 %vm102_vm0, %v693_v28  ;;  %1311 = vmatmul.msk.f32.vlgmr.msrb.gmra.mxu3 %vm102_vm0, %v693_v28 }
 0x1d1   :  { %1308 = vmatmul.msk.f32.gmra.mxu2 %vm102_vm0, %v694_v29  ;;  %1312 = vmatmul.msk.f32.gmra.mxu3 %vm102_vm0, %v694_v29 }
 0x1d9   :  { %1309 = vmatmul.msk.f32.gmra.mxu2 %vm102_vm0, %v695_v53  ;;  %1313 = vmatmul.msk.f32.gmra.mxu3 %vm102_vm0, %v695_v53  ;;  %v700_v53 = vld [vmem:[#allocation2 + $0x18] sm:$0xff] }
 0x1e1   :  { %1314 = vmatmul.msk.f32.gmra.mxu3 %vm102_vm0, %v696_v15  ;;  %1310 = vmatmul.msk.f32.gmra.mxu2 %vm102_vm0, %v696_v15 }
 0x244   :  { %v663_v61 = vpop.f32.mrf.mxu2  ;;  %v683_v14 = vpop.f32.mrf.mxu3 }
 0x245   :  { %v664_v32 = vadd.f32 %v663_v61, %v2078_v56  ;;  %v684_v47 = vadd.f32 %v683_v14, %v2080_v60 }
 0x247   :  { %v686_v63 = vadd.f32 %v1331_v62, %v664_v32  ;;  %v687_v7 = vadd.f32 %v1332_v30, %v684_v47  ;;  %v701_v62 = vld [vmem:[#allocation2 + $0x20] sm:$0xff] }
 0x249   :  { %688 = vst [vmem:[#allocation10] sm:$0xff] %v686_v63 }
 0x24a   :  { %689 = vst [vmem:[#allocation10 + $0x8] sm:$0xff] %v687_v7 }
 0x24c   :  { %v734_v24 = vpop.f32.mrf.mxu2  ;;  %v763_v27 = vpop.f32.mrf.mxu3 }
 0x24d   :  { %v735_v36 = vadd.f32 %v734_v24, %v697_v11  ;;  %v764_v33 = vadd.f32 %v763_v27, %v698_v13  ;;  %v702_v11 = vld [vmem:[#allocation2 + $0x28] sm:$0xff] }
 0x24f   :  { %v775_v12 = vmax.f32 %v735_v36, 0.0  ;;  %v776_v50 = vmax.f32 %v764_v33, 0.0 }
 0x251   :  { %v2090_v16 = vmin.f32 %v775_v12, 6.0  ;;  %v2092_v37 = vmin.f32 %v776_v50, 6.0 }
 0x253   :  { %815 = vrot.lane.b32.xlu2 %v2092_v37, %s1478_s8  ;;  %855 = vrot.lane.b32.xlu0 %v2090_v16, %s1474_s10 }
 0x254   :  { %807 = vrot.lane.b32.xlu1 %v2090_v16, %s1478_s8  ;;  %v737_v57 = vpop.f32.mrf.mxu2  ;;  %v766_v15 = vpop.f32.mrf.mxu3 }
 0x255   :  { %v738_v28 = vadd.f32 %v737_v57, %v699_v46  ;;  %v767_v61 = vadd.f32 %v766_v15, %v700_v53  ;;  %v1333_v57 = vld [vmem:[#allocation2 + $0x38] sm:$0xff]  ;;  %v703_v53 = vld [vmem:[#allocation2 + $0x30] sm:$0xff] }
 0x257   :  { %v777_v29 = vmax.f32 %v738_v28, 0.0  ;;  %v778_v32 = vmax.f32 %v767_v61, 0.0 }
 0x259   :  { %v2118_v14 = vmin.f32 %v777_v29, 6.0  ;;  %v2126_v47 = vmin.f32 %v778_v32, 6.0 }
 0x25b   :  { %903 = vrot.lane.b32.xlu2 %v2090_v16, %s1479_s11  ;;  %911 = vrot.lane.b32.xlu0 %v2092_v37, %s1479_s11 }
 0x25c   :  { %863 = vrot.lane.b32.xlu1 %v2092_v37, %s1474_s10  ;;  %v740_v63 = vpop.f32.mrf.mxu2  ;;  %v769_v13 = vpop.f32.mrf.mxu3 }
 0x25d   :  { %v741_v30 = vadd.f32 %v740_v63, %v701_v62  ;;  %v770_v27 = vadd.f32 %v769_v13, %v702_v11 }
 0x25f   :  { %v779_v7 = vmax.f32 %v741_v30, 0.0  ;;  %v780_v36 = vmax.f32 %v770_v27, 0.0 }
 0x261   :  { %v2152_v24 = vmin.f32 %v779_v7, 6.0  ;;  %v2160_v33 = vmin.f32 %v780_v36, 6.0 }
 0x263   :  { %959 = vrot.lane.b32.xlu2 %v2092_v37, %s1480_s12  ;;  %999 = vrot.lane.b32.xlu0 %v2090_v16, %s1481_s13 }
 0x264   :  { %951 = vrot.lane.b32.xlu1 %v2090_v16, %s1480_s12  ;;  %v772_v50 = vpop.f32.mrf.mxu3  ;;  %v743_v15 = vpop.f32.mrf.mxu2 }
 0x265   :  { %v773_v28 = vadd.f32 %v1333_v57, %v772_v50  ;;  %v744_v62 = vadd.f32 %v743_v15, %v703_v53  ;;  %v831_v50 = vld [vmem:[#allocation5] sm:$0xff]  ;;  %v832_v57 = vld [vmem:[#allocation5 + $0x8] sm:$0xff] }
 0x267   :  { %v782_v29 = vmax.f32 %v773_v28, 0.0  ;;  %v781_v63 = vmax.f32 %v744_v62, 0.0  ;;  %v791_v28 = vld [vmem:[#allocation5 + $0x100] sm:$0xff] }
 0x268   :  { %v799_v6 = vmul.f32 %v791_v28, %v2090_v16 }
 0x269   :  { %v2186_v32 = vmin.f32 %v782_v29, 6.0  ;;  %v2194_v13 = vmin.f32 %v781_v63, 6.0  ;;  %v792_v29 = vld [vmem:[#allocation5 + $0x108] sm:$0xff] }
 0x26b   :  { %1047 = vrot.lane.b32.xlu2 %v2090_v16, %s1482_s14  ;;  %1055 = vrot.lane.b32.xlu0 %v2092_v37, %s1482_s14 }
 0x26c   :  { %1007 = vrot.lane.b32.xlu1 %v2092_v37, %s1481_s13 }
 0x273   :  { %1095 = vrot.lane.b32.xlu2 %v2090_v16, %s1483_s3  ;;  %1103 = vrot.lane.b32.xlu0 %v2092_v37, %s1483_s3 }
 0x274   :  { %809 = vrot.lane.b32.xlu1 %v2118_v14, %s1478_s8 }
 0x27b   :  { %817 = vrot.lane.b32.xlu2 %v2126_v47, %s1478_s8  ;;  %857 = vrot.lane.b32.xlu0 %v2118_v14, %s1474_s10 }
 0x27c   :  { %865 = vrot.lane.b32.xlu1 %v2126_v47, %s1474_s10 }
 0x283   :  { %905 = vrot.lane.b32.xlu2 %v2118_v14, %s1479_s11  ;;  %913 = vrot.lane.b32.xlu0 %v2126_v47, %s1479_s11 }
 0x284   :  { %953 = vrot.lane.b32.xlu1 %v2118_v14, %s1480_s12 }
 0x28b   :  { %961 = vrot.lane.b32.xlu2 %v2126_v47, %s1480_s12  ;;  %1001 = vrot.lane.b32.xlu0 %v2118_v14, %s1481_s13 }
 0x28c   :  { %1009 = vrot.lane.b32.xlu1 %v2126_v47, %s1481_s13 }
 0x293   :  { %1049 = vrot.lane.b32.xlu2 %v2118_v14, %s1482_s14  ;;  %1057 = vrot.lane.b32.xlu0 %v2126_v47, %s1482_s14 }
 0x294   :  { %1097 = vrot.lane.b32.xlu1 %v2118_v14, %s1483_s3 }
 0x29b   :  { %1105 = vrot.lane.b32.xlu2 %v2126_v47, %s1483_s3  ;;  %811 = vrot.lane.b32.xlu0 %v2152_v24, %s1478_s8 }
 0x29c   :  { %1145 = vrot.lane.b32.xlu1 %v2118_v14, %s1484_s2 }
 0x2a3   :  { %907 = vrot.lane.b32.xlu2 %v2152_v24, %s1479_s11  ;;  %859 = vrot.lane.b32.xlu0 %v2152_v24, %s1474_s10 }
 0x2a4   :  { %819 = vrot.lane.b32.xlu1 %v2160_v33, %s1478_s8 }
 0x2ab   :  { %963 = vrot.lane.b32.xlu2 %v2160_v33, %s1480_s12  ;;  %915 = vrot.lane.b32.xlu0 %v2160_v33, %s1479_s11 }
 0x2ac   :  { %867 = vrot.lane.b32.xlu1 %v2160_v33, %s1474_s10 }
 0x2ad   :  { %v816_v12 = vpop.permute.xlu2 %815 }
 0x2b3   :  { %1051 = vrot.lane.b32.xlu2 %v2152_v24, %s1482_s14  ;;  %1003 = vrot.lane.b32.xlu0 %v2152_v24, %s1481_s13 }
 0x2b4   :  { %955 = vrot.lane.b32.xlu1 %v2152_v24, %s1480_s12 }
 0x2b5   :  { %v904_v46 = vpop.permute.xlu2 %903 }
 0x2bb   :  { %1107 = vrot.lane.b32.xlu2 %v2160_v33, %s1483_s3  ;;  %1059 = vrot.lane.b32.xlu0 %v2160_v33, %s1482_s14 }
 0x2bc   :  { %1011 = vrot.lane.b32.xlu1 %v2160_v33, %s1481_s13 }
 0x2bd   :  { %v960_v61 = vpop.permute.xlu2 %959 }
 0x2c3   :  { %821 = vrot.lane.b32.xlu2 %v2186_v32, %s1478_s8  ;;  %1147 = vrot.lane.b32.xlu0 %v2152_v24, %s1484_s2 }
 0x2c4   :  { %1099 = vrot.lane.b32.xlu1 %v2152_v24, %s1483_s3 }
 0x2c5   :  { %v1048_v30 = vpop.permute.xlu2 %1047  ;;  %v856_v7 = vpop.permute.xlu0 %855 }
 0x2c6   :  { %v808_v11 = vpop.permute.xlu1 %807 }
 0x2c7   :  { %v823_v27 = vsel %vm224_vm1, %v808_v11, %v816_v12  ;;  %v827_v36 = vsel %vm224_vm1, %v816_v12, %v808_v11  ;;  %v880_v12 = vld [vmem:[#allocation5 + $0x48] sm:$0xff]  ;;  %v800_v11 = vmul.f32 %v792_v29, %v2092_v37 }
 0x2c8   :  { %v839_v53 = vmul.f32 %v831_v50, %v827_v36  ;;  %v840_v15 = vmul.f32 %v832_v57, %v823_v27  ;;  %v927_v27 = vld [vmem:[#allocation5 + $0x80] sm:$0xff]  ;;  %v928_v50 = vld [vmem:[#allocation5 + $0x88] sm:$0xff] }
 0x2ca   :  { %v847_v3 = vadd.f32 %v839_v53, %v799_v6  ;;  %v848_v35 = vadd.f32 %v840_v15, %v800_v11  ;;  %v975_v53 = vld [vmem:[#allocation5 + $0xc0] sm:$0xff] }
 0x2cb   :  { %861 = vrot.lane.b32.xlu2 %v2194_v13, %s1474_s10  ;;  %869 = vrot.lane.b32.xlu0 %v2186_v32, %s1474_s10  ;;  %v1071_v11 = vld [vmem:[#allocation5 + $0x180] sm:$0xff] }
 0x2cc   :  { %1155 = vrot.lane.b32.xlu1 %v2160_v33, %s1484_s2 }
 0x2cd   :  { %v2206_v62 = vpop.permute.xlu2 %1095  ;;  %v912_v63 = vpop.permute.xlu0 %911 }
 0x2ce   :  { %v919_v60 = vsel %vm323_vm2, %v904_v46, %v912_v63  ;;  %v923_v56 = vsel %vm323_vm2, %v912_v63, %v904_v46  ;;  %v864_v36 = vpop.permute.xlu1 %863 }
 0x2cf   :  { %v871_v57 = vsel %vm273_vm3, %v856_v7, %v864_v36  ;;  %v875_v4 = vsel %vm273_vm3, %v864_v36, %v856_v7  ;;  %v935_v28 = vmul.f32 %v927_v27, %v923_v56  ;;  %v936_v58 = vmul.f32 %v928_v50, %v919_v60  ;;  %v1072_v36 = vld [vmem:[#allocation5 + $0x188] sm:$0xff] }
 0x2d0   :  { %v887_v29 = vmul.f32 %v879_v51, %v875_v4  ;;  %v888_v59 = vmul.f32 %v880_v12, %v871_v57  ;;  %v976_v4 = vld [vmem:[#allocation5 + $0xc8] sm:$0xff]  ;;  %v1334_v57 = vld [vmem:[#allocation5 + $0x140] sm:$0xff] }
 0x2d2   :  { %v895_v26 = vadd.f32 %v887_v29, %v847_v3  ;;  %v896_v23 = vadd.f32 %v888_v59, %v848_v35 }
 0x2d3   :  { %909 = vrot.lane.b32.xlu2 %v2194_v13, %s1479_s11  ;;  %917 = vrot.lane.b32.xlu0 %v2186_v32, %s1479_s11  ;;  %s1280_s11 = sshll.u32 %s2477_s7, 4  ;;  %s1281_s11 = int_to_ptr.hbm [resolvable:$true] %s1280_s11 }
 0x2d4   :  { %813 = vrot.lane.b32.xlu1 %v2194_v13, %s1478_s8  ;;  %v944_v46 = vadd.f32 %v936_v58, %v896_v23  ;;  %v943_v63 = vadd.f32 %v935_v28, %v895_v26  ;;  %v1335_v28 = vld [vmem:[#allocation5 + $0x148] sm:$0xff] }
 0x2d5   :  { %v818_v7 = vpop.permute.xlu2 %817  ;;  %v1000_v6 = vpop.permute.xlu0 %999 }
 0x2d6   :  { %v952_v51 = vpop.permute.xlu1 %951 }
 0x2d7   :  { %v967_v3 = vsel %vm373_vm4, %v952_v51, %v960_v61  ;;  %v971_v59 = vsel %vm373_vm4, %v960_v61, %v952_v51 }
 0x2d8   :  { %v983_v35 = vmul.f32 %v975_v53, %v971_v59  ;;  %v984_v56 = vmul.f32 %v976_v4, %v967_v3 }
 0x2da   :  { %v991_v60 = vadd.f32 %v983_v35, %v943_v63  ;;  %v992_v15 = vadd.f32 %v984_v56, %v944_v46 }
 0x2db   :  { %965 = vrot.lane.b32.xlu2 %v2186_v32, %s1480_s12  ;;  %1005 = vrot.lane.b32.xlu0 %v2194_v13, %s1481_s13 }
 0x2dc   :  { %957 = vrot.lane.b32.xlu1 %v2194_v13, %s1480_s12 }
 0x2dd   :  { %v906_v23 = vpop.permute.xlu2 %905  ;;  %v1056_v26 = vpop.permute.xlu0 %1055 }
 0x2de   :  { %v1063_v58 = vsel %vm473_vm5, %v1048_v30, %v1056_v26  ;;  %v1067_v61 = vsel %vm473_vm5, %v1056_v26, %v1048_v30  ;;  %v1008_v12 = vpop.permute.xlu1 %1007 }
 0x2df   :  { %v1015_v27 = vsel %vm423_vm6, %v1000_v6, %v1008_v12  ;;  %v1019_v50 = vsel %vm423_vm6, %v1008_v12, %v1000_v6  ;;  %v1079_v63 = vmul.f32 %v1071_v11, %v1063_v58  ;;  %v1080_v53 = vmul.f32 %v1072_v36, %v1067_v61  ;;  %v1337_v58 = vld [vmem:[#allocation5 + $0x1c8] sm:$0xff] }
 0x2e0   :  { %v1031_v29 = vmul.f32 %v1334_v57, %v1015_v27  ;;  %v1032_v46 = vmul.f32 %v1335_v28, %v1019_v50 }
 0x2e2   :  { %v1039_v4 = vadd.f32 %v1031_v29, %v991_v60  ;;  %v1040_v51 = vadd.f32 %v1032_v46, %v992_v15  ;;  %v1336_v15 = vld [vmem:[#allocation5 + $0x1c0] sm:$0xff]  ;;  %v1339_v46 = vld [vmem:[#allocation5 + $0x118] sm:$0xff] }
 0x2e3   :  { %1053 = vrot.lane.b32.xlu2 %v2194_v13, %s1482_s14  ;;  %1061 = vrot.lane.b32.xlu0 %v2186_v32, %s1482_s14 }
 0x2e4   :  { %1013 = vrot.lane.b32.xlu1 %v2186_v32, %s1481_s13  ;;  %v1087_v30 = vadd.f32 %v1079_v63, %v1039_v4  ;;  %v1088_v3 = vadd.f32 %v1080_v53, %v1040_v51  ;;  %v802_v63 = vmul.f32 %v1339_v46, %v2126_v47 }
 0x2e5   :  { %v962_v6 = vpop.permute.xlu2 %961  ;;  %v1104_v59 = vpop.permute.xlu0 %1103 }
 0x2e6   :  { %v1111_v35 = vsel %vm523_vm7, %v2206_v62, %v1104_v59  ;;  %v1115_v56 = vsel %vm523_vm7, %v1104_v59, %v2206_v62  ;;  %v810_v60 = vpop.permute.xlu1 %809 }
 0x2e7   :  { %v1127_v26 = vmul.f32 %v1336_v15, %v1111_v35  ;;  %v1128_v61 = vmul.f32 %v1337_v58, %v1115_v56  ;;  %v824_v12 = vsel %vm224_vm1, %v810_v60, %v818_v7  ;;  %v828_v11 = vsel %vm224_vm1, %v818_v7, %v810_v60  ;;  %v1338_v7 = vld [vmem:[#allocation5 + $0x110] sm:$0xff] }
 0x2e8   :  { %v841_v62 = vmul.f32 %v828_v11, %v1766_v5  ;;  %v842_v50 = vmul.f32 %v824_v12, %v1768_v10  ;;  %v801_v28 = vmul.f32 %v1338_v7, %v2118_v14 }
 0x2e9   :  { %v2258_v36 = vadd.f32 %v1127_v26, %v1087_v30  ;;  %v2260_v27 = vadd.f32 %v1128_v61, %v1088_v3 }
 0x2ea   :  { %v849_v51 = vadd.f32 %v841_v62, %v801_v28  ;;  %v850_v10 = vadd.f32 %v842_v50, %v802_v63 }
 0x2eb   :  { %1109 = vrot.lane.b32.xlu2 %v2186_v32, %s1483_s3  ;;  %1149 = vrot.lane.b32.xlu0 %v2194_v13, %s1484_s2 }
 0x2ec   :  { %1101 = vrot.lane.b32.xlu1 %v2194_v13, %s1483_s3 }
 0x2ed   :  { %v1050_v57 = vpop.permute.xlu2 %1049  ;;  %v858_v29 = vpop.permute.xlu0 %857 }
 0x2ee   :  { %v866_v53 = vpop.permute.xlu1 %865 }
 0x2ef   :  { %v872_v4 = vsel %vm273_vm3, %v858_v29, %v866_v53  ;;  %v876_v5 = vsel %vm273_vm3, %v866_v53, %v858_v29 }
 0x2f0   :  { %v889_v30 = vmul.f32 %v876_v5, %v1776_v18  ;;  %v890_v3 = vmul.f32 %v872_v4, %v1778_v19 }
 0x2f2   :  { %v897_v59 = vadd.f32 %v889_v30, %v849_v51  ;;  %v898_v35 = vadd.f32 %v890_v3, %v850_v10 }
 0x2f3   :  { %1153 = vrot.lane.b32.xlu2 %v2126_v47, %s1484_s2  ;;  %1143 = vrot.lane.b32.xlu0 %v2090_v16, %s1484_s2 }
 0x2f4   :  { %1157 = vrot.lane.b32.xlu1 %v2186_v32, %s1484_s2 }
 0x2f5   :  { %v1106_v14 = vpop.permute.xlu2 %1105  ;;  %v914_v56 = vpop.permute.xlu0 %913 }
 0x2f6   :  { %v920_v60 = vsel %vm323_vm2, %v906_v23, %v914_v56  ;;  %v924_v18 = vsel %vm323_vm2, %v914_v56, %v906_v23  ;;  %v954_v19 = vpop.permute.xlu1 %953 }
 0x2f7   :  { %v937_v15 = vmul.f32 %v924_v18, %v1796_v34  ;;  %v938_v26 = vmul.f32 %v920_v60, %v1798_v31  ;;  %v968_v47 = vsel %vm373_vm4, %v954_v19, %v962_v6  ;;  %v972_v16 = vsel %vm373_vm4, %v962_v6, %v954_v19 }
 0x2f8   :  { %v985_v12 = vmul.f32 %v972_v16, %v1808_v43  ;;  %v986_v11 = vmul.f32 %v968_v47, %v1810_v44  ;;  %v2517_v47 = vld [vmem:[#allocation16_spill] sm:$0xff] }
 0x2f9   :  { %v945_v58 = vadd.f32 %v937_v15, %v897_v59  ;;  %v946_v61 = vadd.f32 %v938_v26, %v898_v35 }
 0x2fb   :  { %v993_v62 = vadd.f32 %v985_v12, %v945_v58  ;;  %v994_v50 = vadd.f32 %v986_v11, %v946_v61  ;;  %v883_v12 = vld [vmem:[#allocation5 + $0x60] sm:$0xff]  ;;  %v884_v11 = vld [vmem:[#allocation5 + $0x68] sm:$0xff] }
 0x2fc   :  { %1151 = vrot.lane.b32.xlu1 %v2092_v37, %s1484_s2 }
 0x2fd   :  { %v908_v34 = vpop.permute.xlu2 %907  ;;  %v1002_v23 = vpop.permute.xlu0 %1001 }
 0x2fe   :  { %v1010_v31 = vpop.permute.xlu1 %1009 }
 0x2ff   :  { %v1016_v29 = vsel %vm423_vm6, %v1002_v23, %v1010_v31  ;;  %v1020_v6 = vsel %vm423_vm6, %v1010_v31, %v1002_v23 }
 0x300   :  { %v1033_v7 = vmul.f32 %v1016_v29, %v1816_v52  ;;  %v1034_v43 = vmul.f32 %v1020_v6, %v1818_v54 }
 0x302   :  { %v1041_v28 = vadd.f32 %v1033_v7, %v993_v62  ;;  %v1042_v44 = vadd.f32 %v1034_v43, %v994_v50  ;;  %v2518_v62 = vld [vmem:[#allocation15_spill] sm:$0xff]  ;;  %v2519_v43 = vld [vmem:[#allocation17_spill] sm:$0xff] }
 0x303   :  { %v804_v50 = vmul.f32 %v2160_v33, %v2518_v62 }
 0x305   :  { %v2304_v46 = vpop.permute.xlu2 %963  ;;  %v1058_v63 = vpop.permute.xlu0 %1057 }
 0x306   :  { %v1064_v37 = vsel %vm473_vm5, %v1050_v57, %v1058_v63  ;;  %v1068_v53 = vsel %vm473_vm5, %v1058_v63, %v1050_v57  ;;  %v1098_v4 = vpop.permute.xlu1 %1097 }
 0x307   :  { %v1081_v5 = vmul.f32 %v1064_v37, %v1828_v0  ;;  %v1082_v51 = vmul.f32 %v1068_v53, %v1830_v1  ;;  %v1112_v52 = vsel %vm523_vm7, %v1098_v4, %v1106_v14  ;;  %v1116_v54 = vsel %vm523_vm7, %v1106_v14, %v1098_v4 }
 0x308   :  { %v1129_v3 = vmul.f32 %v1112_v52, %v1838_v17  ;;  %v1130_v59 = vmul.f32 %v1116_v54, %v1840_v20  ;;  %v803_v17 = vmul.f32 %v2152_v24, %v1862_v40 }
 0x309   :  { %v1089_v10 = vadd.f32 %v1081_v5, %v1041_v28  ;;  %v1090_v30 = vadd.f32 %v1082_v51, %v1042_v44  ;;  %v2520_v44 = vld [vmem:[#allocation18_spill] sm:$0xff] }
 0x30b   :  { %v1137_v35 = vadd.f32 %v1129_v3, %v1089_v10  ;;  %v1138_v56 = vadd.f32 %v1130_v59, %v1090_v30 }
 0x30d   :  { %v2318_v57 = vpop.permute.xlu2 %1051  ;;  %v812_v60 = vpop.permute.xlu0 %811 }
 0x30e   :  { %v1146_v0 = vpop.permute.xlu1 %1145 }
 0x315   :  { %v2320_v18 = vpop.permute.xlu2 %1107  ;;  %v860_v1 = vpop.permute.xlu0 %859 }
 0x316   :  { %v820_v19 = vpop.permute.xlu1 %819 }
 0x317   :  { %v825_v15 = vsel %vm224_vm1, %v812_v60, %v820_v19  ;;  %v829_v14 = vsel %vm224_vm1, %v820_v19, %v812_v60 }
 0x318   :  { %v843_v20 = vmul.f32 %v829_v14, %v1864_v25  ;;  %v844_v16 = vmul.f32 %v825_v15, %v2517_v47 }
 0x31a   :  { %v851_v26 = vadd.f32 %v843_v20, %v803_v17  ;;  %v852_v24 = vadd.f32 %v844_v16, %v804_v50 }
 0x31d   :  { %v822_v58 = vpop.permute.xlu2 %821  ;;  %v916_v61 = vpop.permute.xlu0 %915 }
 0x31e   :  { %v868_v23 = vpop.permute.xlu1 %867  ;;  %v921_v31 = vsel %vm323_vm2, %v908_v34, %v916_v61  ;;  %v925_v29 = vsel %vm323_vm2, %v916_v61, %v908_v34 }
 0x31f   :  { %v873_v40 = vsel %vm273_vm3, %v860_v1, %v868_v23  ;;  %v877_v25 = vsel %vm273_vm3, %v868_v23, %v860_v1  ;;  %v939_v28 = vmul.f32 %v925_v29, %v2519_v43  ;;  %v940_v33 = vmul.f32 %v921_v31, %v2520_v44  ;;  %v1027_v43 = vld [vmem:[#allocation5 + $0x160] sm:$0xff] }
 0x320   :  { %v891_v6 = vmul.f32 %v883_v12, %v877_v25  ;;  %v892_v7 = vmul.f32 %v884_v11, %v873_v40  ;;  %v2521_v40 = vld [vmem:[#allocation19_spill] sm:$0xff] }
 0x322   :  { %v899_v63 = vadd.f32 %v891_v6, %v851_v26  ;;  %v900_v37 = vadd.f32 %v892_v7, %v852_v24 }
 0x324   :  { %v947_v53 = vadd.f32 %v939_v28, %v899_v63  ;;  %v948_v4 = vadd.f32 %v940_v33, %v900_v37  ;;  %v1028_v28 = vld [vmem:[#allocation5 + $0x168] sm:$0xff]  ;;  %v885_v37 = vld [vmem:[#allocation5 + $0x70] sm:$0xff] }
 0x325   :  { %v862_v5 = vpop.permute.xlu2 %861  ;;  %v1004_v51 = vpop.permute.xlu0 %1003  ;;  %v2524_v33 = vld [vmem:[#allocation22_spill] sm:$0xff] }
 0x326   :  { %v956_v34 = vpop.permute.xlu1 %955  ;;  %v806_v63 = vmul.f32 %v2186_v32, %v2524_v33 }
 0x327   :  { %v969_v50 = vsel %vm373_vm4, %v956_v34, %v2304_v46  ;;  %v973_v23 = vsel %vm373_vm4, %v2304_v46, %v956_v34  ;;  %v886_v34 = vld [vmem:[#allocation5 + $0x78] sm:$0xff] }
 0x32d   :  { %v910_v52 = vpop.permute.xlu2 %909  ;;  %v1060_v54 = vpop.permute.xlu0 %1059 }
 0x32e   :  { %v1012_v10 = vpop.permute.xlu1 %1011  ;;  %v1069_v32 = vsel %vm473_vm5, %v1060_v54, %v2318_v57 }
 0x32f   :  { %v1017_v44 = vsel %vm423_vm6, %v1004_v51, %v1012_v10  ;;  %v1021_v46 = vsel %vm423_vm6, %v1012_v10, %v1004_v51 }
 0x335   :  { %v966_v30 = vpop.permute.xlu2 %965  ;;  %v2342_v3 = vpop.permute.xlu0 %1147 }
 0x336   :  { %v1100_v59 = vpop.permute.xlu1 %1099 }
 0x33d   :  { %v2344_v60 = vpop.permute.xlu2 %1053  ;;  %v870_v1 = vpop.permute.xlu0 %869 }
 0x33e   :  { %v2346_v19 = vpop.permute.xlu1 %1155 }
 0x345   :  { %v2348_v15 = vpop.permute.xlu2 %1109  ;;  %v918_v14 = vpop.permute.xlu0 %917 }
 0x346   :  { %v814_v17 = vpop.permute.xlu1 %813 }
 0x347   :  { %v826_v61 = vsel %vm224_vm1, %v814_v17, %v822_v58  ;;  %v830_v12 = vsel %vm224_vm1, %v822_v58, %v814_v17  ;;  %v2522_v58 = vld [vmem:[#allocation20_spill] sm:$0xff]  ;;  %v874_v17 = vsel %vm273_vm3, %v862_v5, %v870_v1 }
 0x348   :  { %v845_v25 = vmul.f32 %v830_v12, %v2521_v40  ;;  %v846_v24 = vmul.f32 %v826_v61, %v2522_v58  ;;  %v982_v40 = vld [vmem:[#allocation5 + $0xf8] sm:$0xff] }
 0x34a   :  { %v854_v12 = vadd.f32 %v846_v24, %v806_v63 }
 0x34d   :  { %v1154_v20 = vpop.permute.xlu2 %1153 }
 0x34e   :  { %v1160_v26 = vsel %vm573_vm8, %v1146_v0, %v1154_v20  ;;  %v1164_v47 = vsel %vm573_vm8, %v1154_v20, %v1146_v0  ;;  %v958_v16 = vpop.permute.xlu1 %957  ;;  %v1006_v0 = vpop.permute.xlu0 %1005  ;;  %v878_v20 = vsel %vm273_vm3, %v870_v1, %v862_v5  ;;  %v922_v5 = vsel %vm323_vm2, %v910_v52, %v918_v14 }
 0x34f   :  { %v1177_v11 = vmul.f32 %v1160_v26, %v1977_v38  ;;  %v1178_v62 = vmul.f32 %v1164_v47, %v1979_v55  ;;  %v1340_v38 = vld [vmem:[#allocation5 + $0xe0] sm:$0xff]  ;;  %v1341_v55 = vld [vmem:[#allocation5 + $0xe8] sm:$0xff]  ;;  %v1035_v26 = vmul.f32 %v1027_v43, %v1017_v44  ;;  %v1036_v47 = vmul.f32 %v1028_v28, %v1021_v46 }
 0x350   :  { %v987_v6 = vmul.f32 %v1340_v38, %v973_v23  ;;  %v988_v7 = vmul.f32 %v1341_v55, %v969_v50  ;;  %v894_v50 = vmul.f32 %v886_v34, %v874_v17  ;;  %v926_v1 = vsel %vm323_vm2, %v918_v14, %v910_v52  ;;  %v981_v23 = vld [vmem:[#allocation5 + $0xf0] sm:$0xff]  ;;  %v1342_v44 = vld [vmem:[#allocation5 + $0x1a0] sm:$0xff] }
 0x351   :  { %v2366_v31 = vadd.f32 %v1177_v11, %v1137_v35  ;;  %v2368_v29 = vadd.f32 %v1178_v62, %v1138_v56  ;;  %v2523_v35 = vld [vmem:[#allocation21_spill] sm:$0xff]  ;;  %v893_v62 = vmul.f32 %v885_v37, %v878_v20  ;;  %v1113_v38 = vsel %vm523_vm7, %v1100_v59, %v2320_v18  ;;  %v1029_v14 = vld [vmem:[#allocation5 + $0x170] sm:$0xff]  ;;  %v1172_v20 = vld [vmem:[#allocation5 + $0x228] sm:$0xff] }
 0x352   :  { %v805_v56 = vmul.f32 %v2194_v13, %v2523_v35  ;;  %v995_v51 = vadd.f32 %v987_v6, %v947_v53  ;;  %v996_v10 = vadd.f32 %v988_v7, %v948_v4  ;;  %v1065_v13 = vsel %vm473_vm5, %v2318_v57, %v1060_v54  ;;  %v1030_v6 = vld [vmem:[#allocation5 + $0x178] sm:$0xff]  ;;  %v1343_v35 = vld [vmem:[#allocation5 + $0x1a8] sm:$0xff] }
 0x353   :  { %v970_v53 = vsel %vm373_vm4, %v958_v16, %v966_v30  ;;  %v974_v4 = vsel %vm373_vm4, %v966_v30, %v958_v16  ;;  %v902_v57 = vadd.f32 %v894_v50, %v854_v12  ;;  %v1117_v52 = vsel %vm523_vm7, %v2320_v18, %v1100_v59 }
 0x354   :  { %v853_v61 = vadd.f32 %v845_v25, %v805_v56  ;;  %v1043_v25 = vadd.f32 %v1035_v26, %v995_v51  ;;  %v1044_v58 = vadd.f32 %v1036_v47, %v996_v10  ;;  %v941_v16 = vmul.f32 %v926_v1, %v1941_v49  ;;  %v1125_v10 = vld [vmem:[#allocation5 + $0x1f0] sm:$0xff] }
 0x355   :  { %v942_v7 = vmul.f32 %v922_v5, %v1943_v9  ;;  %v989_v43 = vmul.f32 %v981_v23, %v974_v4  ;;  %v990_v28 = vmul.f32 %v982_v40, %v970_v53  ;;  %v1083_v46 = vmul.f32 %v1342_v44, %v1065_v13  ;;  %v1126_v13 = vld [vmem:[#allocation5 + $0x1f8] sm:$0xff] }
 0x356   :  { %v1014_v11 = vpop.permute.xlu1 %1013  ;;  %v901_v24 = vadd.f32 %v893_v62, %v853_v61  ;;  %v1062_v54 = vpop.permute.xlu0 %1061  ;;  %v1084_v56 = vmul.f32 %v1343_v35, %v1069_v32  ;;  %v1131_v34 = vmul.f32 %v1113_v38, %v1933_v2  ;;  %v1132_v17 = vmul.f32 %v1117_v52, %v1935_v39  ;;  %v1078_v2 = vld [vmem:[#allocation5 + $0x1b8] sm:$0xff]  ;;  %v2525_v35 = vld [vmem:[#allocation23_spill] sm:$0xff] }
 0x357   :  { %v1018_v55 = vsel %vm423_vm6, %v1006_v0, %v1014_v11  ;;  %v1022_v30 = vsel %vm423_vm6, %v1014_v11, %v1006_v0  ;;  %v950_v18 = vadd.f32 %v942_v7, %v902_v57  ;;  %v1171_v0 = vld [vmem:[#allocation5 + $0x220] sm:$0xff]  ;;  %v1161_v49 = vsel %vm573_vm8, %v2342_v3, %v2346_v19  ;;  %v1077_v11 = vld [vmem:[#allocation5 + $0x1b0] sm:$0xff] }
 0x358   :  { %v949_v33 = vadd.f32 %v941_v16, %v901_v24  ;;  %v1037_v59 = vmul.f32 %v1029_v14, %v1018_v55  ;;  %v1038_v63 = vmul.f32 %v1030_v6, %v1022_v30  ;;  %v1165_v9 = vsel %vm573_vm8, %v2346_v19, %v2342_v3 }
 0x359   :  { %v1091_v26 = vadd.f32 %v1083_v46, %v1043_v25  ;;  %v1092_v47 = vadd.f32 %v1084_v56, %v1044_v58  ;;  %v998_v12 = vadd.f32 %v990_v28, %v950_v18  ;;  %v1066_v39 = vsel %vm473_vm5, %v2344_v60, %v1062_v54 }
 0x35a   :  { %v997_v61 = vadd.f32 %v989_v43, %v949_v33  ;;  %v1070_v51 = vsel %vm473_vm5, %v1062_v54, %v2344_v60  ;;  %v1179_v32 = vmul.f32 %v1171_v0, %v1161_v49  ;;  %v1180_v62 = vmul.f32 %v1172_v20, %v1165_v9  ;;  %v2526_v33 = vld [vmem:[#allocation24_spill] sm:$0xff] }
 0x35b   :  { %v1046_v5 = vadd.f32 %v1038_v63, %v998_v12  ;;  %v1139_v1 = vadd.f32 %v1131_v34, %v1091_v26  ;;  %v1140_v23 = vadd.f32 %v1132_v17, %v1092_v47  ;;  %v1085_v40 = vmul.f32 %v1077_v11, %v1066_v39  ;;  %v2527_v17 = vld [vmem:[#allocation25_spill] sm:$0xff]  ;;  %v2529_v11 = vld [vmem:[#allocation27_spill] sm:$0xff]  ;;  %v2530_v39 = vld [vmem:[#allocation28_spill] sm:$0xff] }
 0x35c   :  { %v1045_v50 = vadd.f32 %v1037_v59, %v997_v61  ;;  %v1086_v53 = vmul.f32 %v1078_v2, %v1070_v51  ;;  %v1201_v44 = vadd.f32 %v2366_v31, %v2003_v21  ;;  %v1202_v46 = vadd.f32 %v2368_v29, %v2005_v22  ;;  %v2528_v29 = vld [vmem:[#allocation26_spill] sm:$0xff] }
 0x35d   :  { %v1187_v54 = vadd.f32 %v1179_v32, %v1139_v1  ;;  %v1188_v38 = vadd.f32 %v1180_v62, %v1140_v23  ;;  %v2531_v32 = vld [vmem:[#allocation29_spill] sm:$0xff]  ;;  %v2532_v62 = vld [vmem:[#allocation32_spill] sm:$0xff]  ;;  %v2534_v23 = vld [vmem:[#allocation30_spill] sm:$0xff] }
 0x35e   :  { %v1102_v37 = vpop.permute.xlu1 %1101  ;;  %v1150_v4 = vpop.permute.xlu0 %1149  ;;  %v1093_v58 = vadd.f32 %v1085_v40, %v1045_v50  ;;  %v1094_v24 = vadd.f32 %v1086_v53, %v1046_v5  ;;  %v1209_v21 = vmax.f32 %v1201_v44, 0.0  ;;  %v1210_v31 = vmax.f32 %v1202_v46, 0.0  ;;  %v2533_v5 = vld [vmem:[#allocation33_spill] sm:$0xff]  ;;  %v2535_v53 = vld [vmem:[#allocation31_spill] sm:$0xff] }
 0x35f   :  { %v1114_v3 = vsel %vm523_vm7, %v1102_v37, %v2348_v15  ;;  %v1118_v19 = vsel %vm523_vm7, %v2348_v15, %v1102_v37  ;;  %v1203_v43 = vadd.f32 %v1187_v54, %v1997_v42  ;;  %v1204_v28 = vadd.f32 %v1188_v38, %v1999_v8 }
 0x360   :  { %v1133_v60 = vmul.f32 %v1125_v10, %v1114_v3  ;;  %v1134_v25 = vmul.f32 %v1126_v13, %v1118_v19  ;;  %v1217_v48 = vmin.f32 %v1209_v21, 6.0  ;;  %v1218_v12 = vmin.f32 %v1210_v31, 6.0 }
 0x361   :  { %v1211_v37 = vmax.f32 %v1203_v43, 0.0  ;;  %v1212_v34 = vmax.f32 %v1204_v28, 0.0 }
 0x362   :  { %v1141_v14 = vadd.f32 %v1133_v60, %v1093_v58  ;;  %v1142_v6 = vadd.f32 %v1134_v25, %v1094_v24 }
 0x363   :  { %v1219_v9 = vmin.f32 %v1211_v37, 6.0  ;;  %v1220_v26 = vmin.f32 %v1212_v34, 6.0 }
 0x366   :  { %v1158_v57 = vpop.permute.xlu1 %1157  ;;  %v1144_v59 = vpop.permute.xlu0 %1143 }
 0x367   :  { %v1162_v52 = vsel %vm573_vm8, %v1150_v4, %v1158_v57  ;;  %v1166_v15 = vsel %vm573_vm8, %v1158_v57, %v1150_v4 }
 0x368   :  { %v1181_v55 = vmul.f32 %v1162_v52, %v1981_v41  ;;  %v1182_v30 = vmul.f32 %v1166_v15, %v1983_v45 }
 0x36a   :  { %v1189_v16 = vadd.f32 %v1181_v55, %v1141_v14  ;;  %v1190_v7 = vadd.f32 %v1182_v30, %v1142_v6 }
 0x36c   :  { %v1205_v56 = vadd.f32 %v1189_v16, %v2525_v35  ;;  %v1206_v18 = vadd.f32 %v1190_v7, %v2526_v33 }
 0x36e   :  { %v1152_v41 = vpop.permute.xlu1 %1151  ;;  %v1213_v63 = vmax.f32 %v1205_v56, 0.0  ;;  %v1214_v45 = vmax.f32 %v1206_v18, 0.0 }
 0x36f   :  { %v1159_v42 = vsel %vm573_vm8, %v1144_v59, %v1152_v41  ;;  %v1163_v8 = vsel %vm573_vm8, %v1152_v41, %v1144_v59 }
 0x370   :  { %v1175_v22 = vmul.f32 %v1159_v42, %v2527_v17  ;;  %v1176_v0 = vmul.f32 %v1163_v8, %v2528_v29  ;;  %v1221_v20 = vmin.f32 %v1213_v63, 6.0  ;;  %v1222_v49 = vmin.f32 %v1214_v45, 6.0 }
 0x372   :  { %1241 = vmatpush.msrb.mxu0 %v1221_v20  ;;  %1261 = vmatpush.msrb.mxu1 %v1222_v49  ;;  %v1183_v47 = vadd.f32 %v1175_v22, %v2258_v36  ;;  %v1184_v61 = vadd.f32 %v1176_v0, %v2260_v27 }
 0x374   :  { %1242 = vmatpush.msrb.mxu0 %v1219_v9  ;;  %1262 = vmatpush.msrb.mxu1 %v1220_v26  ;;  %v1199_v2 = vadd.f32 %v1183_v47, %v2529_v11  ;;  %v1200_v51 = vadd.f32 %v1184_v61, %v2530_v39 }
 0x376   :  { %1243 = vmatpush.msrb.mxu0 %v1217_v48  ;;  %1263 = vmatpush.msrb.mxu1 %v1218_v12  ;;  %v1207_v10 = vmax.f32 %v1199_v2, 0.0  ;;  %v1208_v13 = vmax.f32 %v1200_v51, 0.0 }
 0x378   :  { %v1215_v3 = vmin.f32 %v1207_v10, 6.0  ;;  %v1216_v19 = vmin.f32 %v1208_v13, 6.0 }
 0x37a   :  { %1244 = vmatpush.msrb.mxu0 %v1215_v3  ;;  %1264 = vmatpush.msrb.mxu1 %v1216_v19 }
 0x37b   :  { %1315 = vmatmul.msk.f32.vlgmr.msrb.gmra.mxu0 %vm642_vm9, %v2531_v32  ;;  %1316 = vmatmul.msk.f32.vlgmr.msrb.gmra.mxu1 %vm642_vm9, %v2531_v32 }
 0x3f8   :  { %v1246_v36 = vpop.f32.mrf.mxu0  ;;  %v1266_v27 = vpop.f32.mrf.mxu1 }
 0x3f9   :  { %v1247_v50 = vadd.f32 %v1246_v36, %v2532_v62  ;;  %v1267_v1 = vadd.f32 %v1266_v27, %v2533_v5 }
 0x3fb   :  { %v1269_v40 = vadd.f32 %v2534_v23, %v1247_v50  ;;  %v1270_v4 = vadd.f32 %v2535_v53, %v1267_v1 }
 0x3fd   :  { %1272 = vst [vmem:[#allocation10 + $0x10] sm:$0xff] %v1269_v40 }
 0x3fe   :  { %1273 = vst [vmem:[#allocation10 + $0x18] sm:$0xff] %v1270_v4 }
 0x3ff   :  { %1286 = dma.vmem_to_hbm [thread:$0]  %s1279_s29, 512, %s1281_s11, [#allocation4], %s1473_s9, %s1473_s9, %s1474_s10  }
 0x400   :  { %1470 = dma.done.wait [#allocation4], 512  }
 0x401   :  { %1471 = vsyncadd [#allocation4], 4294966784 }
 0x402   :  { %1291 = vsyncpa [#allocation3], 1 }
 0x403   :  { %1292 = vsyncpa [#allocation6], 1 }
 0x404   :  { %1293 = vsyncpa [#allocation9], 1 }
 0x405   :  { %1294 = vsyncpa [#allocation4], 1 }

</bundles_post_ra>
